<compile_context>
chip_gen: v7x
topology: tpu7x:2x2x1
jax: 0.10.0
libtpu: 0.0.40
codegen_flags: <defaults>
</compile_context>

<pallas_src>
import functools
import math

import jax
import jax.numpy as jnp
from jax.experimental import pallas as pl
from jax.experimental.pallas import tpu as pltpu

EPS = 1e-10
# bf16 MXU inputs (f32 accumulation).  Set to jnp.float32 for exact-f32 matmuls.
MXU_IN_DTYPE = jnp.bfloat16

_VMEM_SPEC = pl.BlockSpec(memory_space=pltpu.MemorySpace.VMEM)


# ---------------------------------------------------------------------------
# Fused kernel: (corrupted + clean) encoder in one stacked pass + denoising
# decoder.  Rows [0, n) of every stacked activation are the corrupted pass,
# rows [n, 2n) the clean pass; within each pass rows [0, bs) are labeled.
# ---------------------------------------------------------------------------
def _ladder_fused_kernel(L, bs, n, noisy, *refs):
    # ---- unpack refs (inputs then outputs) ----
    idx = 0
    hh0_ref = refs[idx]; idx += 1                     # (2n, d0) stacked [corrupted; clean] input
    w_refs = refs[idx: idx + L]; idx += L             # W[l]     : (d_l, d_{l+1})  bf16
    gamma_refs = refs[idx: idx + L]; idx += L         # gamma[l] : (1, d_{l+1})    f32
    beta_refs = refs[idx: idx + L]; idx += L          # beta[l]  : (1, d_{l+1})    f32
    v_refs = refs[idx: idx + L]; idx += L             # V[l]     : (d_{l+1}, d_l)  bf16
    g_refs = refs[idx: idx + L + 1]; idx += L + 1     # G[l]     : (16, d_l) rows 0..9 = a1..a10
    zn_refs = refs[idx: idx + L]; idx += L            # noise[l] : (2n, d_{l+1}), pre-scaled, clean rows = 0
    y_ref = refs[idx]; idx += 1                       # (n, d_L) clean softmax output
    yc_ref = refs[idx]; idx += 1                      # (n, d_L) corrupted softmax output
    zbn_refs = refs[idx: idx + L + 1]                 # z_est_bn[l] : (nu, d_l)

    nu = n - bs
    n2 = 2 * n
    f32 = jnp.float32

    hh = hh0_ref[...]

    # ---- hoisted (2n,1) row-group mask columns (built once, reused per layer) ----
    row = jax.lax.broadcasted_iota(jnp.int32, (n2, 1), 0)
    corr_col = (row < n).astype(f32)                                   # corrupted pass rows
    clab_col = (row < bs).astype(f32)                                  # corrupted labeled
    llab_col = jnp.logical_and(row >= n, row < n + bs).astype(f32)     # clean labeled
    cunl_col = corr_col - clab_col                                     # corrupted unlabeled
    lunl_col = 1.0 - corr_col - llab_col                               # clean unlabeled

    inv_bs = f32(1.0 / bs)
    inv_nu = f32(1.0 / nu)
    # corrupted labeled var: torch.var (unbiased, /(bs-1)) when noise > 0,
    # nn.BatchNorm1d (biased, /bs) when noise == 0; clean labeled always biased.
    inv_cl_den = f32(1.0 / (bs - 1)) if noisy else f32(1.0 / bs)
    inv_unl = f32(1.0 / (nu - 1))                                      # unlabeled var: unbiased

    corr_z_u = {0: hh[bs:n]}        # corrupted unlabeled input (= corrupted z[0])
    clean_m, clean_v = {}, {}

    # -------------------- fused encoders (fully unrolled) --------------------
    for l in range(1, L + 1):
        z_pre = jnp.dot(hh.astype(MXU_IN_DTYPE), w_refs[l - 1][...],
                        preferred_element_type=jnp.float32)            # (2n, d)

        # group sums: derive unlabeled means from totals (fewer masked reductions)
        s_all = jnp.sum(z_pre, axis=0, keepdims=True)
        s_corr = jnp.sum(z_pre * corr_col, axis=0, keepdims=True)
        s_cl = jnp.sum(z_pre * clab_col, axis=0, keepdims=True)
        s_ll = jnp.sum(z_pre * llab_col, axis=0, keepdims=True)

        m_cl = s_cl * inv_bs
        m_cu = (s_corr - s_cl) * inv_nu
        m_ll = s_ll * inv_bs
        m_lu = (s_all - s_corr - s_ll) * inv_nu

        d_cl = (z_pre - m_cl) * clab_col
        d_cu = (z_pre - m_cu) * cunl_col
        d_ll = (z_pre - m_ll) * llab_col
        d_lu = (z_pre - m_lu) * lunl_col

        v_cl = jnp.sum(d_cl * d_cl, axis=0, keepdims=True) * inv_cl_den
        v_cu = jnp.sum(d_cu * d_cu, axis=0, keepdims=True) * inv_unl
        v_ll = jnp.sum(d_ll * d_ll, axis=0, keepdims=True) * inv_bs
        v_lu = jnp.sum(d_lu * d_lu, axis=0, keepdims=True) * inv_unl

        # masks partition the rows, so this is exactly per-group batch norm
        z = (d_cl * jax.lax.rsqrt(v_cl + EPS)
             + d_cu * jax.lax.rsqrt(v_cu + EPS)
             + d_ll * jax.lax.rsqrt(v_ll + EPS)
             + d_lu * jax.lax.rsqrt(v_lu + EPS))

        if noisy:
            # pre-scaled Gaussian noise; clean-pass rows are zero
            z = z + zn_refs[l - 1][...]

        gamma = gamma_refs[l - 1][...]
        beta = beta_refs[l - 1][...]
        if l == L:
            logits = gamma * (z + beta)
            logits = logits - jnp.max(logits, axis=-1, keepdims=True)
            e = jnp.exp(logits)
            hh = e / jnp.sum(e, axis=-1, keepdims=True)
        else:
            hh = jnp.maximum(z + beta, 0.0)

        corr_z_u[l] = z[bs:n]        # corrupted unlabeled z (post-noise)
        clean_m[l] = m_lu            # clean unlabeled mean
        clean_v[l] = v_lu            # clean unlabeled (unbiased) variance

    y_c = hh[:n]                     # corrupted-pass softmax output
    y = hh[n:]                       # clean-pass softmax output
    y_ref[...] = y.astype(y_ref.dtype)
    yc_ref[...] = y_c.astype(yc_ref.dtype)

    # -------------------- denoising decoder --------------------
    z_est = None
    for l in range(L, -1, -1):
        if l == L:
            u = y_c[bs:]
        else:
            u = jnp.dot(z_est.astype(MXU_IN_DTYPE), v_refs[l][...],
                        preferred_element_type=jnp.float32)
        # batch_normalization(u): mean over rows, unbiased variance, eps=1e-10
        um = jnp.sum(u, axis=0, keepdims=True) * inv_nu
        uc = u - um
        uv = jnp.sum(uc * uc, axis=0, keepdims=True) * inv_unl
        u = uc * jax.lax.rsqrt(uv + EPS)

        a = g_refs[l][...]           # (16, d); rows 0..9 are a1..a10
        a1, a2, a3, a4, a5 = (a[0:1, :], a[1:2, :], a[2:3, :], a[3:4, :], a[4:5, :])
        a6, a7, a8, a9, a10 = (a[5:6, :], a[6:7, :], a[7:8, :], a[8:9, :], a[9:10, :])

        z_c = corr_z_u[l]
        mu = a1 * jax.nn.sigmoid(a2 * u + a3) + a4 * u + a5
        vg = a6 * jax.nn.sigmoid(a7 * u + a8) + a9 * u + a10
        z_est = (z_c - mu) * vg + mu

        if l == 0:
            # clean m/v default to 0 and (1 - 1e-10) at the input layer
            zbn = z_est / f32(1.0 - 1e-10)
        else:
            # NB: the reference divides by v (the variance), not sqrt(v)
            zbn = (z_est - clean_m[l]) / clean_v[l]
        zbn_refs[l][...] = zbn.astype(zbn_refs[l].dtype)


# ---------------------------------------------------------------------------
# Parameter init (matches the PyTorch module's __init__ shapes / values)
# ---------------------------------------------------------------------------
def init_params(layer_sizes, key):
    L = len(layer_sizes) - 1
    keys = jax.random.split(key, 2 * L)
    W, V, gamma, beta, G = [], [], [], [], []
    for l in range(L):
        din, dout = layer_sizes[l], layer_sizes[l + 1]
        W.append(jax.random.normal(keys[l], (din, dout), jnp.float32)
                 / math.sqrt(din))
        V.append(jax.random.normal(keys[L + l], (dout, din), jnp.float32)
                 / math.sqrt(dout))
        gamma.append(jnp.ones((1, dout), jnp.float32))
        beta.append(jnp.zeros((1, dout), jnp.float32))
    for l in range(L + 1):
        d = layer_sizes[l]
        # a1..a10 in rows 0..9, padded to 16 rows (sublane-tile aligned);
        # a2 (row 1) and a7 (row 6) init to ones.
        a = jnp.zeros((16, d), jnp.float32).at[1].set(1.0).at[6].set(1.0)
        G.append(a)
    return dict(layer_sizes=layer_sizes, W=W, V=V, gamma=gamma, beta=beta, G=G)


# ---------------------------------------------------------------------------
# Full Ladder forward (training mode) — one gridless pallas_call.
# ---------------------------------------------------------------------------
def ladder_forward(x, noise, params, bs, noise_key):
    layer_sizes = params["layer_sizes"]
    L = len(layer_sizes) - 1
    n = x.shape[0]
    nu = n - bs
    d_last = layer_sizes[-1]
    noisy = float(noise) > 0.0

    # Host-side corruption noise (RNG stream is jax.random, so y_c / z_est_bn
    # are statistically -- not elementwise -- comparable to the torch reference).
    keys = jax.random.split(noise_key, L + 1)
    if noisy:
        x_corr = x + jnp.float32(noise) * jax.random.normal(keys[0], x.shape, jnp.float32)
    else:
        x_corr = x
    hh0 = jnp.concatenate([x_corr, x], axis=0)            # (2n, d0): [corrupted; clean]

    znoise = []
    for l in range(1, L + 1):
        d = layer_sizes[l]
        if noisy:
            nz = jnp.float32(noise) * jax.random.normal(keys[l], (n, d), jnp.float32)
        else:
            nz = jnp.zeros((n, d), jnp.float32)
        znoise.append(jnp.concatenate([nz, jnp.zeros((n, d), jnp.float32)], axis=0))

    # Pre-cast weights to the MXU input dtype on the host (halves weight DMA
    # bytes and removes per-layer in-kernel casts).
    w_mx = [w.astype(MXU_IN_DTYPE) for w in params["W"]]
    v_mx = [v.astype(MXU_IN_DTYPE) for v in params["V"]]

    args = ([hh0] + w_mx + list(params["gamma"]) + list(params["beta"])
            + v_mx + list(params["G"]) + znoise)

    out_shape = [jax.ShapeDtypeStruct((n, d_last), jnp.float32),   # y   (clean)
                 jax.ShapeDtypeStruct((n, d_last), jnp.float32)]   # y_c (corrupted)
    out_shape += [jax.ShapeDtypeStruct((nu, layer_sizes[l]), jnp.float32)
                  for l in range(L + 1)]                            # z_est_bn[l]

    # Advisory cost estimate for XLA's scheduler.
    flops = 0
    for l in range(L):
        flops += 2 * (2 * n) * layer_sizes[l] * layer_sizes[l + 1]   # fused encoders
        flops += 2 * nu * layer_sizes[l + 1] * layer_sizes[l]        # decoder
    transcendentals = 2 * n * d_last + 2 * nu * sum(layer_sizes)     # softmax exp + sigmoids
    bytes_accessed = sum(int(a.size) * a.dtype.itemsize for a in args)
    bytes_accessed += sum(math.prod(s.shape) * jnp.dtype(s.dtype).itemsize
                          for s in out_shape)

    kernel = functools.partial(_ladder_fused_kernel, L, bs, n, noisy)
    outs = pl.pallas_call(
        kernel,
        out_shape=out_shape,
        in_specs=[_VMEM_SPEC] * len(args),
        out_specs=[_VMEM_SPEC] * len(out_shape),
        cost_estimate=pl.CostEstimate(flops=int(flops),
                                      transcendentals=int(transcendentals),
                                      bytes_accessed=int(bytes_accessed)),
    )(*args)

    y, y_c = outs[0], outs[1]
    z_est_bn = {l: outs[2 + l] for l in range(L + 1)}
    return y, y_c, z_est_bn


if __name__ == "__main__":
    layer_sizes = [32, 16, 10]   # input dim 32, hidden 16, 10 classes
    batch_size = 4               # labeled rows; unlabeled rows = 4 -> N = 8
    noise = 0.3

    key = jax.random.PRNGKey(0)
    kp, kx, kn = jax.random.split(key, 3)

    params = init_params(layer_sizes, kp)
    x = jax.random.normal(kx, (2 * batch_size, layer_sizes[0]), jnp.float32)

    y, y_c, z_est_bn = ladder_forward(x, noise, params, batch_size, noise_key=kn)

    jax.block_until_ready(y)
    jax.block_until_ready(y_c)
    for l in z_est_bn:
        jax.block_until_ready(z_est_bn[l])

    assert y.shape == (2 * batch_size, layer_sizes[-1])
    assert y_c.shape == (2 * batch_size, layer_sizes[-1])
    for l, d in enumerate(layer_sizes):
        assert z_est_bn[l].shape == (batch_size, d)
    assert bool(jnp.all(jnp.isfinite(y)))
    assert bool(jnp.all(jnp.isfinite(y_c)))
    # softmax rows should sum to ~1
    assert bool(jnp.all(jnp.abs(jnp.sum(y, axis=-1) - 1.0) < 1e-3))
    for l in z_est_bn:
        assert bool(jnp.all(jnp.isfinite(z_est_bn[l])))
    print("KERNEL_OK")
</pallas_src>

<mosaic_0001>
module attributes {stable_mosaic.version = 11 : i64} {
  func.func @_ladder_fused_kernel(%arg0: memref<16x32xf32, #tpu.memory_space<vmem>>, %arg1: memref<32x16xbf16, #tpu.memory_space<vmem>>, %arg2: memref<16x10xbf16, #tpu.memory_space<vmem>>, %arg3: memref<1x16xf32, #tpu.memory_space<vmem>>, %arg4: memref<1x10xf32, #tpu.memory_space<vmem>>, %arg5: memref<1x16xf32, #tpu.memory_space<vmem>>, %arg6: memref<1x10xf32, #tpu.memory_space<vmem>>, %arg7: memref<16x32xbf16, #tpu.memory_space<vmem>>, %arg8: memref<10x16xbf16, #tpu.memory_space<vmem>>, %arg9: memref<16x32xf32, #tpu.memory_space<vmem>>, %arg10: memref<16x16xf32, #tpu.memory_space<vmem>>, %arg11: memref<16x10xf32, #tpu.memory_space<vmem>>, %arg12: memref<16x16xf32, #tpu.memory_space<vmem>>, %arg13: memref<16x10xf32, #tpu.memory_space<vmem>>, %arg14: memref<8x10xf32, #tpu.memory_space<vmem>>, %arg15: memref<8x10xf32, #tpu.memory_space<vmem>>, %arg16: memref<4x32xf32, #tpu.memory_space<vmem>>, %arg17: memref<4x16xf32, #tpu.memory_space<vmem>>, %arg18: memref<4x10xf32, #tpu.memory_space<vmem>>) attributes {dimension_semantics = [], scalar_prefetch = 0 : i64, scratch_operands = 0 : i64, tpu.core_type = #tpu.core_type<tc>} {
    %c0 = arith.constant 0 : index
    %c0_0 = arith.constant 0 : index
    %0 = vector.load %arg0[%c0, %c0_0] : memref<16x32xf32, #tpu.memory_space<vmem>>, vector<16x32xf32>
    %1 = tpu.iota {dimensions = array<i32: 0>} : vector<16x1xi32>
    %c8_i32 = arith.constant 8 : i32
    %2 = vector.broadcast %c8_i32 : i32 to vector<16x1xi32>
    %3 = arith.cmpi slt, %1, %2 : vector<16x1xi32>
    %4 = arith.extui %3 : vector<16x1xi1> to vector<16x1xi32>
    %5 = arith.sitofp %4 : vector<16x1xi32> to vector<16x1xf32>
    %c4_i32 = arith.constant 4 : i32
    %6 = vector.broadcast %c4_i32 : i32 to vector<16x1xi32>
    %7 = arith.cmpi slt, %1, %6 : vector<16x1xi32>
    %8 = arith.extui %7 : vector<16x1xi1> to vector<16x1xi32>
    %9 = arith.sitofp %8 : vector<16x1xi32> to vector<16x1xf32>
    %c8_i32_1 = arith.constant 8 : i32
    %10 = vector.broadcast %c8_i32_1 : i32 to vector<16x1xi32>
    %11 = arith.cmpi sge, %1, %10 : vector<16x1xi32>
    %c12_i32 = arith.constant 12 : i32
    %12 = vector.broadcast %c12_i32 : i32 to vector<16x1xi32>
    %13 = arith.cmpi slt, %1, %12 : vector<16x1xi32>
    %14 = arith.andi %11, %13 : vector<16x1xi1>
    %15 = arith.extui %14 : vector<16x1xi1> to vector<16x1xi32>
    %16 = arith.sitofp %15 : vector<16x1xi32> to vector<16x1xf32>
    %17 = arith.subf %5, %9 : vector<16x1xf32>
    %cst = arith.constant 1.000000e+00 : f32
    %18 = vector.broadcast %cst : f32 to vector<16x1xf32>
    %19 = arith.subf %18, %5 : vector<16x1xf32>
    %20 = arith.subf %19, %16 : vector<16x1xf32>
    %21 = vector.extract_strided_slice %0 {offsets = [4, 0], sizes = [4, 32], strides = [1, 1]} : vector<16x32xf32> to vector<4x32xf32>
    %22 = arith.truncf %0 : vector<16x32xf32> to vector<16x32xbf16>
    %c0_2 = arith.constant 0 : index
    %c0_3 = arith.constant 0 : index
    %23 = vector.load %arg1[%c0_2, %c0_3] : memref<32x16xbf16, #tpu.memory_space<vmem>>, vector<32x16xbf16>
    %cst_4 = arith.constant dense<0.000000e+00> : vector<16x16xf32>
    %24 = tpu.matmul %22, %23, %cst_4 {dimension_numbers = #tpu.dot_dimension_numbers<[1], [0], [0], [1], [0, 0, 1, 1], [], []>} : vector<16x32xbf16>, vector<32x16xbf16>, vector<16x16xf32> -> vector<16x16xf32>
    %cst_5 = arith.constant dense<0.000000e+00> : vector<16xf32>
    %25 = vector.multi_reduction <add>, %24, %cst_5 [0] : vector<16x16xf32> to vector<16xf32>
    %26 = vector.shape_cast %25 : vector<16xf32> to vector<1x16xf32>
    %27 = vector.broadcast %5 : vector<16x1xf32> to vector<16x16xf32>
    %28 = arith.mulf %24, %27 : vector<16x16xf32>
    %cst_6 = arith.constant dense<0.000000e+00> : vector<16xf32>
    %29 = vector.multi_reduction <add>, %28, %cst_6 [0] : vector<16x16xf32> to vector<16xf32>
    %30 = vector.shape_cast %29 : vector<16xf32> to vector<1x16xf32>
    %31 = vector.broadcast %9 : vector<16x1xf32> to vector<16x16xf32>
    %32 = arith.mulf %24, %31 : vector<16x16xf32>
    %cst_7 = arith.constant dense<0.000000e+00> : vector<16xf32>
    %33 = vector.multi_reduction <add>, %32, %cst_7 [0] : vector<16x16xf32> to vector<16xf32>
    %34 = vector.shape_cast %33 : vector<16xf32> to vector<1x16xf32>
    %35 = vector.broadcast %16 : vector<16x1xf32> to vector<16x16xf32>
    %36 = arith.mulf %24, %35 : vector<16x16xf32>
    %cst_8 = arith.constant dense<0.000000e+00> : vector<16xf32>
    %37 = vector.multi_reduction <add>, %36, %cst_8 [0] : vector<16x16xf32> to vector<16xf32>
    %38 = vector.shape_cast %37 : vector<16xf32> to vector<1x16xf32>
    %cst_9 = arith.constant 2.500000e-01 : f32
    %39 = vector.broadcast %cst_9 : f32 to vector<1x16xf32>
    %40 = arith.mulf %34, %39 : vector<1x16xf32>
    %41 = arith.subf %30, %34 : vector<1x16xf32>
    %cst_10 = arith.constant 2.500000e-01 : f32
    %42 = vector.broadcast %cst_10 : f32 to vector<1x16xf32>
    %43 = arith.mulf %41, %42 : vector<1x16xf32>
    %cst_11 = arith.constant 2.500000e-01 : f32
    %44 = vector.broadcast %cst_11 : f32 to vector<1x16xf32>
    %45 = arith.mulf %38, %44 : vector<1x16xf32>
    %46 = arith.subf %26, %30 : vector<1x16xf32>
    %47 = arith.subf %46, %38 : vector<1x16xf32>
    %cst_12 = arith.constant 2.500000e-01 : f32
    %48 = vector.broadcast %cst_12 : f32 to vector<1x16xf32>
    %49 = arith.mulf %47, %48 : vector<1x16xf32>
    %50 = vector.broadcast %40 : vector<1x16xf32> to vector<16x16xf32>
    %51 = arith.subf %24, %50 : vector<16x16xf32>
    %52 = vector.broadcast %9 : vector<16x1xf32> to vector<16x16xf32>
    %53 = arith.mulf %51, %52 : vector<16x16xf32>
    %54 = vector.broadcast %43 : vector<1x16xf32> to vector<16x16xf32>
    %55 = arith.subf %24, %54 : vector<16x16xf32>
    %56 = vector.broadcast %17 : vector<16x1xf32> to vector<16x16xf32>
    %57 = arith.mulf %55, %56 : vector<16x16xf32>
    %58 = vector.broadcast %45 : vector<1x16xf32> to vector<16x16xf32>
    %59 = arith.subf %24, %58 : vector<16x16xf32>
    %60 = vector.broadcast %16 : vector<16x1xf32> to vector<16x16xf32>
    %61 = arith.mulf %59, %60 : vector<16x16xf32>
    %62 = vector.broadcast %49 : vector<1x16xf32> to vector<16x16xf32>
    %63 = arith.subf %24, %62 : vector<16x16xf32>
    %64 = vector.broadcast %20 : vector<16x1xf32> to vector<16x16xf32>
    %65 = arith.mulf %63, %64 : vector<16x16xf32>
    %66 = arith.mulf %53, %53 : vector<16x16xf32>
    %cst_13 = arith.constant dense<0.000000e+00> : vector<16xf32>
    %67 = vector.multi_reduction <add>, %66, %cst_13 [0] : vector<16x16xf32> to vector<16xf32>
    %68 = vector.shape_cast %67 : vector<16xf32> to vector<1x16xf32>
    %cst_14 = arith.constant 0.333333343 : f32
    %69 = vector.broadcast %cst_14 : f32 to vector<1x16xf32>
    %70 = arith.mulf %68, %69 : vector<1x16xf32>
    %71 = arith.mulf %57, %57 : vector<16x16xf32>
    %cst_15 = arith.constant dense<0.000000e+00> : vector<16xf32>
    %72 = vector.multi_reduction <add>, %71, %cst_15 [0] : vector<16x16xf32> to vector<16xf32>
    %73 = vector.shape_cast %72 : vector<16xf32> to vector<1x16xf32>
    %cst_16 = arith.constant 0.333333343 : f32
    %74 = vector.broadcast %cst_16 : f32 to vector<1x16xf32>
    %75 = arith.mulf %73, %74 : vector<1x16xf32>
    %76 = arith.mulf %61, %61 : vector<16x16xf32>
    %cst_17 = arith.constant dense<0.000000e+00> : vector<16xf32>
    %77 = vector.multi_reduction <add>, %76, %cst_17 [0] : vector<16x16xf32> to vector<16xf32>
    %78 = vector.shape_cast %77 : vector<16xf32> to vector<1x16xf32>
    %cst_18 = arith.constant 2.500000e-01 : f32
    %79 = vector.broadcast %cst_18 : f32 to vector<1x16xf32>
    %80 = arith.mulf %78, %79 : vector<1x16xf32>
    %81 = arith.mulf %65, %65 : vector<16x16xf32>
    %cst_19 = arith.constant dense<0.000000e+00> : vector<16xf32>
    %82 = vector.multi_reduction <add>, %81, %cst_19 [0] : vector<16x16xf32> to vector<16xf32>
    %83 = vector.shape_cast %82 : vector<16xf32> to vector<1x16xf32>
    %cst_20 = arith.constant 0.333333343 : f32
    %84 = vector.broadcast %cst_20 : f32 to vector<1x16xf32>
    %85 = arith.mulf %83, %84 : vector<1x16xf32>
    %cst_21 = arith.constant 1.000000e-10 : f32
    %86 = vector.broadcast %cst_21 : f32 to vector<1x16xf32>
    %87 = arith.addf %70, %86 : vector<1x16xf32>
    %88 = math.rsqrt %87 : vector<1x16xf32>
    %89 = vector.broadcast %88 : vector<1x16xf32> to vector<16x16xf32>
    %90 = arith.mulf %53, %89 : vector<16x16xf32>
    %cst_22 = arith.constant 1.000000e-10 : f32
    %91 = vector.broadcast %cst_22 : f32 to vector<1x16xf32>
    %92 = arith.addf %75, %91 : vector<1x16xf32>
    %93 = math.rsqrt %92 : vector<1x16xf32>
    %94 = vector.broadcast %93 : vector<1x16xf32> to vector<16x16xf32>
    %95 = arith.mulf %57, %94 : vector<16x16xf32>
    %96 = arith.addf %90, %95 : vector<16x16xf32>
    %cst_23 = arith.constant 1.000000e-10 : f32
    %97 = vector.broadcast %cst_23 : f32 to vector<1x16xf32>
    %98 = arith.addf %80, %97 : vector<1x16xf32>
    %99 = math.rsqrt %98 : vector<1x16xf32>
    %100 = vector.broadcast %99 : vector<1x16xf32> to vector<16x16xf32>
    %101 = arith.mulf %61, %100 : vector<16x16xf32>
    %102 = arith.addf %96, %101 : vector<16x16xf32>
    %cst_24 = arith.constant 1.000000e-10 : f32
    %103 = vector.broadcast %cst_24 : f32 to vector<1x16xf32>
    %104 = arith.addf %85, %103 : vector<1x16xf32>
    %105 = math.rsqrt %104 : vector<1x16xf32>
    %106 = vector.broadcast %105 : vector<1x16xf32> to vector<16x16xf32>
    %107 = arith.mulf %65, %106 : vector<16x16xf32>
    %108 = arith.addf %102, %107 : vector<16x16xf32>
    %c0_25 = arith.constant 0 : index
    %c0_26 = arith.constant 0 : index
    %109 = vector.load %arg12[%c0_25, %c0_26] : memref<16x16xf32, #tpu.memory_space<vmem>>, vector<16x16xf32>
    %110 = arith.addf %108, %109 : vector<16x16xf32>
    %c0_27 = arith.constant 0 : index
    %c0_28 = arith.constant 0 : index
    %111 = vector.load %arg5[%c0_27, %c0_28] : memref<1x16xf32, #tpu.memory_space<vmem>>, vector<1x16xf32>
    %112 = vector.broadcast %111 : vector<1x16xf32> to vector<16x16xf32>
    %113 = arith.addf %110, %112 : vector<16x16xf32>
    %cst_29 = arith.constant 0.000000e+00 : f32
    %114 = vector.broadcast %cst_29 : f32 to vector<16x16xf32>
    %115 = arith.maximumf %113, %114 : vector<16x16xf32>
    %116 = vector.extract_strided_slice %110 {offsets = [4, 0], sizes = [4, 16], strides = [1, 1]} : vector<16x16xf32> to vector<4x16xf32>
    %117 = arith.truncf %115 : vector<16x16xf32> to vector<16x16xbf16>
    %c0_30 = arith.constant 0 : index
    %c0_31 = arith.constant 0 : index
    %118 = vector.load %arg2[%c0_30, %c0_31] : memref<16x10xbf16, #tpu.memory_space<vmem>>, vector<16x10xbf16>
    %cst_32 = arith.constant dense<0.000000e+00> : vector<16x10xf32>
    %119 = tpu.matmul %117, %118, %cst_32 {dimension_numbers = #tpu.dot_dimension_numbers<[1], [0], [0], [1], [0, 0, 1, 1], [], []>} : vector<16x16xbf16>, vector<16x10xbf16>, vector<16x10xf32> -> vector<16x10xf32>
    %cst_33 = arith.constant dense<0.000000e+00> : vector<10xf32>
    %120 = vector.multi_reduction <add>, %119, %cst_33 [0] : vector<16x10xf32> to vector<10xf32>
    %121 = vector.shape_cast %120 : vector<10xf32> to vector<1x10xf32>
    %122 = vector.broadcast %5 : vector<16x1xf32> to vector<16x10xf32>
    %123 = arith.mulf %119, %122 : vector<16x10xf32>
    %cst_34 = arith.constant dense<0.000000e+00> : vector<10xf32>
    %124 = vector.multi_reduction <add>, %123, %cst_34 [0] : vector<16x10xf32> to vector<10xf32>
    %125 = vector.shape_cast %124 : vector<10xf32> to vector<1x10xf32>
    %126 = vector.broadcast %9 : vector<16x1xf32> to vector<16x10xf32>
    %127 = arith.mulf %119, %126 : vector<16x10xf32>
    %cst_35 = arith.constant dense<0.000000e+00> : vector<10xf32>
    %128 = vector.multi_reduction <add>, %127, %cst_35 [0] : vector<16x10xf32> to vector<10xf32>
    %129 = vector.shape_cast %128 : vector<10xf32> to vector<1x10xf32>
    %130 = vector.broadcast %16 : vector<16x1xf32> to vector<16x10xf32>
    %131 = arith.mulf %119, %130 : vector<16x10xf32>
    %cst_36 = arith.constant dense<0.000000e+00> : vector<10xf32>
    %132 = vector.multi_reduction <add>, %131, %cst_36 [0] : vector<16x10xf32> to vector<10xf32>
    %133 = vector.shape_cast %132 : vector<10xf32> to vector<1x10xf32>
    %cst_37 = arith.constant 2.500000e-01 : f32
    %134 = vector.broadcast %cst_37 : f32 to vector<1x10xf32>
    %135 = arith.mulf %129, %134 : vector<1x10xf32>
    %136 = arith.subf %125, %129 : vector<1x10xf32>
    %cst_38 = arith.constant 2.500000e-01 : f32
    %137 = vector.broadcast %cst_38 : f32 to vector<1x10xf32>
    %138 = arith.mulf %136, %137 : vector<1x10xf32>
    %cst_39 = arith.constant 2.500000e-01 : f32
    %139 = vector.broadcast %cst_39 : f32 to vector<1x10xf32>
    %140 = arith.mulf %133, %139 : vector<1x10xf32>
    %141 = arith.subf %121, %125 : vector<1x10xf32>
    %142 = arith.subf %141, %133 : vector<1x10xf32>
    %cst_40 = arith.constant 2.500000e-01 : f32
    %143 = vector.broadcast %cst_40 : f32 to vector<1x10xf32>
    %144 = arith.mulf %142, %143 : vector<1x10xf32>
    %145 = vector.broadcast %135 : vector<1x10xf32> to vector<16x10xf32>
    %146 = arith.subf %119, %145 : vector<16x10xf32>
    %147 = vector.broadcast %9 : vector<16x1xf32> to vector<16x10xf32>
    %148 = arith.mulf %146, %147 : vector<16x10xf32>
    %149 = vector.broadcast %138 : vector<1x10xf32> to vector<16x10xf32>
    %150 = arith.subf %119, %149 : vector<16x10xf32>
    %151 = vector.broadcast %17 : vector<16x1xf32> to vector<16x10xf32>
    %152 = arith.mulf %150, %151 : vector<16x10xf32>
    %153 = vector.broadcast %140 : vector<1x10xf32> to vector<16x10xf32>
    %154 = arith.subf %119, %153 : vector<16x10xf32>
    %155 = vector.broadcast %16 : vector<16x1xf32> to vector<16x10xf32>
    %156 = arith.mulf %154, %155 : vector<16x10xf32>
    %157 = vector.broadcast %144 : vector<1x10xf32> to vector<16x10xf32>
    %158 = arith.subf %119, %157 : vector<16x10xf32>
    %159 = vector.broadcast %20 : vector<16x1xf32> to vector<16x10xf32>
    %160 = arith.mulf %158, %159 : vector<16x10xf32>
    %161 = arith.mulf %148, %148 : vector<16x10xf32>
    %cst_41 = arith.constant dense<0.000000e+00> : vector<10xf32>
    %162 = vector.multi_reduction <add>, %161, %cst_41 [0] : vector<16x10xf32> to vector<10xf32>
    %163 = vector.shape_cast %162 : vector<10xf32> to vector<1x10xf32>
    %cst_42 = arith.constant 0.333333343 : f32
    %164 = vector.broadcast %cst_42 : f32 to vector<1x10xf32>
    %165 = arith.mulf %163, %164 : vector<1x10xf32>
    %166 = arith.mulf %152, %152 : vector<16x10xf32>
    %cst_43 = arith.constant dense<0.000000e+00> : vector<10xf32>
    %167 = vector.multi_reduction <add>, %166, %cst_43 [0] : vector<16x10xf32> to vector<10xf32>
    %168 = vector.shape_cast %167 : vector<10xf32> to vector<1x10xf32>
    %cst_44 = arith.constant 0.333333343 : f32
    %169 = vector.broadcast %cst_44 : f32 to vector<1x10xf32>
    %170 = arith.mulf %168, %169 : vector<1x10xf32>
    %171 = arith.mulf %156, %156 : vector<16x10xf32>
    %cst_45 = arith.constant dense<0.000000e+00> : vector<10xf32>
    %172 = vector.multi_reduction <add>, %171, %cst_45 [0] : vector<16x10xf32> to vector<10xf32>
    %173 = vector.shape_cast %172 : vector<10xf32> to vector<1x10xf32>
    %cst_46 = arith.constant 2.500000e-01 : f32
    %174 = vector.broadcast %cst_46 : f32 to vector<1x10xf32>
    %175 = arith.mulf %173, %174 : vector<1x10xf32>
    %176 = arith.mulf %160, %160 : vector<16x10xf32>
    %cst_47 = arith.constant dense<0.000000e+00> : vector<10xf32>
    %177 = vector.multi_reduction <add>, %176, %cst_47 [0] : vector<16x10xf32> to vector<10xf32>
    %178 = vector.shape_cast %177 : vector<10xf32> to vector<1x10xf32>
    %cst_48 = arith.constant 0.333333343 : f32
    %179 = vector.broadcast %cst_48 : f32 to vector<1x10xf32>
    %180 = arith.mulf %178, %179 : vector<1x10xf32>
    %cst_49 = arith.constant 1.000000e-10 : f32
    %181 = vector.broadcast %cst_49 : f32 to vector<1x10xf32>
    %182 = arith.addf %165, %181 : vector<1x10xf32>
    %183 = math.rsqrt %182 : vector<1x10xf32>
    %184 = vector.broadcast %183 : vector<1x10xf32> to vector<16x10xf32>
    %185 = arith.mulf %148, %184 : vector<16x10xf32>
    %cst_50 = arith.constant 1.000000e-10 : f32
    %186 = vector.broadcast %cst_50 : f32 to vector<1x10xf32>
    %187 = arith.addf %170, %186 : vector<1x10xf32>
    %188 = math.rsqrt %187 : vector<1x10xf32>
    %189 = vector.broadcast %188 : vector<1x10xf32> to vector<16x10xf32>
    %190 = arith.mulf %152, %189 : vector<16x10xf32>
    %191 = arith.addf %185, %190 : vector<16x10xf32>
    %cst_51 = arith.constant 1.000000e-10 : f32
    %192 = vector.broadcast %cst_51 : f32 to vector<1x10xf32>
    %193 = arith.addf %175, %192 : vector<1x10xf32>
    %194 = math.rsqrt %193 : vector<1x10xf32>
    %195 = vector.broadcast %194 : vector<1x10xf32> to vector<16x10xf32>
    %196 = arith.mulf %156, %195 : vector<16x10xf32>
    %197 = arith.addf %191, %196 : vector<16x10xf32>
    %cst_52 = arith.constant 1.000000e-10 : f32
    %198 = vector.broadcast %cst_52 : f32 to vector<1x10xf32>
    %199 = arith.addf %180, %198 : vector<1x10xf32>
    %200 = math.rsqrt %199 : vector<1x10xf32>
    %201 = vector.broadcast %200 : vector<1x10xf32> to vector<16x10xf32>
    %202 = arith.mulf %160, %201 : vector<16x10xf32>
    %203 = arith.addf %197, %202 : vector<16x10xf32>
    %c0_53 = arith.constant 0 : index
    %c0_54 = arith.constant 0 : index
    %204 = vector.load %arg13[%c0_53, %c0_54] : memref<16x10xf32, #tpu.memory_space<vmem>>, vector<16x10xf32>
    %205 = arith.addf %203, %204 : vector<16x10xf32>
    %c0_55 = arith.constant 0 : index
    %c0_56 = arith.constant 0 : index
    %206 = vector.load %arg4[%c0_55, %c0_56] : memref<1x10xf32, #tpu.memory_space<vmem>>, vector<1x10xf32>
    %c0_57 = arith.constant 0 : index
    %c0_58 = arith.constant 0 : index
    %207 = vector.load %arg6[%c0_57, %c0_58] : memref<1x10xf32, #tpu.memory_space<vmem>>, vector<1x10xf32>
    %208 = vector.broadcast %207 : vector<1x10xf32> to vector<16x10xf32>
    %209 = arith.addf %205, %208 : vector<16x10xf32>
    %210 = vector.broadcast %206 : vector<1x10xf32> to vector<16x10xf32>
    %211 = arith.mulf %210, %209 : vector<16x10xf32>
    %cst_59 = arith.constant dense<0xFF800000> : vector<16xf32>
    %212 = vector.multi_reduction <maximumf>, %211, %cst_59 [1] : vector<16x10xf32> to vector<16xf32>
    %213 = vector.shape_cast %212 : vector<16xf32> to vector<16x1xf32>
    %214 = vector.broadcast %213 : vector<16x1xf32> to vector<16x10xf32>
    %215 = arith.subf %211, %214 : vector<16x10xf32>
    %216 = math.exp %215 : vector<16x10xf32>
    %cst_60 = arith.constant dense<0.000000e+00> : vector<16xf32>
    %217 = vector.multi_reduction <add>, %216, %cst_60 [1] : vector<16x10xf32> to vector<16xf32>
    %218 = vector.shape_cast %217 : vector<16xf32> to vector<16x1xf32>
    %219 = vector.broadcast %218 : vector<16x1xf32> to vector<16x10xf32>
    %220 = arith.divf %216, %219 : vector<16x10xf32>
    %221 = vector.extract_strided_slice %205 {offsets = [4, 0], sizes = [4, 10], strides = [1, 1]} : vector<16x10xf32> to vector<4x10xf32>
    %222 = vector.extract_strided_slice %220 {offsets = [0, 0], sizes = [8, 10], strides = [1, 1]} : vector<16x10xf32> to vector<8x10xf32>
    %223 = vector.extract_strided_slice %220 {offsets = [8, 0], sizes = [8, 10], strides = [1, 1]} : vector<16x10xf32> to vector<8x10xf32>
    %c0_61 = arith.constant 0 : index
    %c0_62 = arith.constant 0 : index
    %224 = vector.load %arg14[%c0_61, %c0_62] : memref<8x10xf32, #tpu.memory_space<vmem>>, vector<8x10xf32>
    tpu.vector_store %arg14[%c0_61, %c0_62], %223 {strides = array<i32>} : memref<8x10xf32, #tpu.memory_space<vmem>>, vector<8x10xf32>,
    %c0_63 = arith.constant 0 : index
    %c0_64 = arith.constant 0 : index
    %225 = vector.load %arg15[%c0_63, %c0_64] : memref<8x10xf32, #tpu.memory_space<vmem>>, vector<8x10xf32>
    tpu.vector_store %arg15[%c0_63, %c0_64], %222 {strides = array<i32>} : memref<8x10xf32, #tpu.memory_space<vmem>>, vector<8x10xf32>,
    %226 = vector.extract_strided_slice %222 {offsets = [4, 0], sizes = [4, 10], strides = [1, 1]} : vector<8x10xf32> to vector<4x10xf32>
    %cst_65 = arith.constant dense<0.000000e+00> : vector<10xf32>
    %227 = vector.multi_reduction <add>, %226, %cst_65 [0] : vector<4x10xf32> to vector<10xf32>
    %228 = vector.shape_cast %227 : vector<10xf32> to vector<1x10xf32>
    %cst_66 = arith.constant 2.500000e-01 : f32
    %229 = vector.broadcast %cst_66 : f32 to vector<1x10xf32>
    %230 = arith.mulf %228, %229 : vector<1x10xf32>
    %231 = vector.broadcast %230 : vector<1x10xf32> to vector<4x10xf32>
    %232 = arith.subf %226, %231 : vector<4x10xf32>
    %233 = arith.mulf %232, %232 : vector<4x10xf32>
    %cst_67 = arith.constant dense<0.000000e+00> : vector<10xf32>
    %234 = vector.multi_reduction <add>, %233, %cst_67 [0] : vector<4x10xf32> to vector<10xf32>
    %235 = vector.shape_cast %234 : vector<10xf32> to vector<1x10xf32>
    %cst_68 = arith.constant 0.333333343 : f32
    %236 = vector.broadcast %cst_68 : f32 to vector<1x10xf32>
    %237 = arith.mulf %235, %236 : vector<1x10xf32>
    %cst_69 = arith.constant 1.000000e-10 : f32
    %238 = vector.broadcast %cst_69 : f32 to vector<1x10xf32>
    %239 = arith.addf %237, %238 : vector<1x10xf32>
    %240 = math.rsqrt %239 : vector<1x10xf32>
    %241 = vector.broadcast %240 : vector<1x10xf32> to vector<4x10xf32>
    %242 = arith.mulf %232, %241 : vector<4x10xf32>
    %c0_70 = arith.constant 0 : index
    %c0_71 = arith.constant 0 : index
    %243 = vector.load %arg11[%c0_70, %c0_71] : memref<16x10xf32, #tpu.memory_space<vmem>>, vector<16x10xf32>
    %244 = vector.extract_strided_slice %243 {offsets = [0, 0], sizes = [1, 10], strides = [1, 1]} : vector<16x10xf32> to vector<1x10xf32>
    %245 = vector.extract_strided_slice %243 {offsets = [1, 0], sizes = [1, 10], strides = [1, 1]} : vector<16x10xf32> to vector<1x10xf32>
    %246 = vector.extract_strided_slice %243 {offsets = [2, 0], sizes = [1, 10], strides = [1, 1]} : vector<16x10xf32> to vector<1x10xf32>
    %247 = vector.extract_strided_slice %243 {offsets = [3, 0], sizes = [1, 10], strides = [1, 1]} : vector<16x10xf32> to vector<1x10xf32>
    %248 = vector.extract_strided_slice %243 {offsets = [4, 0], sizes = [1, 10], strides = [1, 1]} : vector<16x10xf32> to vector<1x10xf32>
    %249 = vector.extract_strided_slice %243 {offsets = [5, 0], sizes = [1, 10], strides = [1, 1]} : vector<16x10xf32> to vector<1x10xf32>
    %250 = vector.extract_strided_slice %243 {offsets = [6, 0], sizes = [1, 10], strides = [1, 1]} : vector<16x10xf32> to vector<1x10xf32>
    %251 = vector.extract_strided_slice %243 {offsets = [7, 0], sizes = [1, 10], strides = [1, 1]} : vector<16x10xf32> to vector<1x10xf32>
    %252 = vector.extract_strided_slice %243 {offsets = [8, 0], sizes = [1, 10], strides = [1, 1]} : vector<16x10xf32> to vector<1x10xf32>
    %253 = vector.extract_strided_slice %243 {offsets = [9, 0], sizes = [1, 10], strides = [1, 1]} : vector<16x10xf32> to vector<1x10xf32>
    %254 = vector.broadcast %245 : vector<1x10xf32> to vector<4x10xf32>
    %255 = arith.mulf %254, %242 : vector<4x10xf32>
    %256 = vector.broadcast %246 : vector<1x10xf32> to vector<4x10xf32>
    %257 = arith.addf %255, %256 : vector<4x10xf32>
    %258 = arith.negf %257 : vector<4x10xf32>
    %259 = math.exp %258 : vector<4x10xf32>
    %cst_72 = arith.constant 1.000000e+00 : f32
    %260 = vector.broadcast %cst_72 : f32 to vector<4x10xf32>
    %261 = arith.addf %260, %259 : vector<4x10xf32>
    %262 = arith.divf %260, %261 : vector<4x10xf32>
    %263 = vector.broadcast %244 : vector<1x10xf32> to vector<4x10xf32>
    %264 = arith.mulf %263, %262 : vector<4x10xf32>
    %265 = vector.broadcast %247 : vector<1x10xf32> to vector<4x10xf32>
    %266 = arith.mulf %265, %242 : vector<4x10xf32>
    %267 = arith.addf %264, %266 : vector<4x10xf32>
    %268 = vector.broadcast %248 : vector<1x10xf32> to vector<4x10xf32>
    %269 = arith.addf %267, %268 : vector<4x10xf32>
    %270 = vector.broadcast %250 : vector<1x10xf32> to vector<4x10xf32>
    %271 = arith.mulf %270, %242 : vector<4x10xf32>
    %272 = vector.broadcast %251 : vector<1x10xf32> to vector<4x10xf32>
    %273 = arith.addf %271, %272 : vector<4x10xf32>
    %274 = arith.negf %273 : vector<4x10xf32>
    %275 = math.exp %274 : vector<4x10xf32>
    %cst_73 = arith.constant 1.000000e+00 : f32
    %276 = vector.broadcast %cst_73 : f32 to vector<4x10xf32>
    %277 = arith.addf %276, %275 : vector<4x10xf32>
    %278 = arith.divf %276, %277 : vector<4x10xf32>
    %279 = vector.broadcast %249 : vector<1x10xf32> to vector<4x10xf32>
    %280 = arith.mulf %279, %278 : vector<4x10xf32>
    %281 = vector.broadcast %252 : vector<1x10xf32> to vector<4x10xf32>
    %282 = arith.mulf %281, %242 : vector<4x10xf32>
    %283 = arith.addf %280, %282 : vector<4x10xf32>
    %284 = vector.broadcast %253 : vector<1x10xf32> to vector<4x10xf32>
    %285 = arith.addf %283, %284 : vector<4x10xf32>
    %286 = arith.subf %221, %269 : vector<4x10xf32>
    %287 = arith.mulf %286, %285 : vector<4x10xf32>
    %288 = arith.addf %287, %269 : vector<4x10xf32>
    %289 = vector.broadcast %144 : vector<1x10xf32> to vector<4x10xf32>
    %290 = arith.subf %288, %289 : vector<4x10xf32>
    %291 = vector.broadcast %180 : vector<1x10xf32> to vector<4x10xf32>
    %292 = arith.divf %290, %291 : vector<4x10xf32>
    %c0_74 = arith.constant 0 : index
    %c0_75 = arith.constant 0 : index
    %293 = vector.load %arg18[%c0_74, %c0_75] : memref<4x10xf32, #tpu.memory_space<vmem>>, vector<4x10xf32>
    tpu.vector_store %arg18[%c0_74, %c0_75], %292 {strides = array<i32>} : memref<4x10xf32, #tpu.memory_space<vmem>>, vector<4x10xf32>,
    %294 = arith.truncf %288 : vector<4x10xf32> to vector<4x10xbf16>
    %c0_76 = arith.constant 0 : index
    %c0_77 = arith.constant 0 : index
    %295 = vector.load %arg8[%c0_76, %c0_77] : memref<10x16xbf16, #tpu.memory_space<vmem>>, vector<10x16xbf16>
    %cst_78 = arith.constant dense<0.000000e+00> : vector<4x16xf32>
    %296 = tpu.matmul %294, %295, %cst_78 {dimension_numbers = #tpu.dot_dimension_numbers<[1], [0], [0], [1], [0, 0, 1, 1], [], []>} : vector<4x10xbf16>, vector<10x16xbf16>, vector<4x16xf32> -> vector<4x16xf32>
    %cst_79 = arith.constant dense<0.000000e+00> : vector<16xf32>
    %297 = vector.multi_reduction <add>, %296, %cst_79 [0] : vector<4x16xf32> to vector<16xf32>
    %298 = vector.shape_cast %297 : vector<16xf32> to vector<1x16xf32>
    %cst_80 = arith.constant 2.500000e-01 : f32
    %299 = vector.broadcast %cst_80 : f32 to vector<1x16xf32>
    %300 = arith.mulf %298, %299 : vector<1x16xf32>
    %301 = vector.broadcast %300 : vector<1x16xf32> to vector<4x16xf32>
    %302 = arith.subf %296, %301 : vector<4x16xf32>
    %303 = arith.mulf %302, %302 : vector<4x16xf32>
    %cst_81 = arith.constant dense<0.000000e+00> : vector<16xf32>
    %304 = vector.multi_reduction <add>, %303, %cst_81 [0] : vector<4x16xf32> to vector<16xf32>
    %305 = vector.shape_cast %304 : vector<16xf32> to vector<1x16xf32>
    %cst_82 = arith.constant 0.333333343 : f32
    %306 = vector.broadcast %cst_82 : f32 to vector<1x16xf32>
    %307 = arith.mulf %305, %306 : vector<1x16xf32>
    %cst_83 = arith.constant 1.000000e-10 : f32
    %308 = vector.broadcast %cst_83 : f32 to vector<1x16xf32>
    %309 = arith.addf %307, %308 : vector<1x16xf32>
    %310 = math.rsqrt %309 : vector<1x16xf32>
    %311 = vector.broadcast %310 : vector<1x16xf32> to vector<4x16xf32>
    %312 = arith.mulf %302, %311 : vector<4x16xf32>
    %c0_84 = arith.constant 0 : index
    %c0_85 = arith.constant 0 : index
    %313 = vector.load %arg10[%c0_84, %c0_85] : memref<16x16xf32, #tpu.memory_space<vmem>>, vector<16x16xf32>
    %314 = vector.extract_strided_slice %313 {offsets = [0, 0], sizes = [1, 16], strides = [1, 1]} : vector<16x16xf32> to vector<1x16xf32>
    %315 = vector.extract_strided_slice %313 {offsets = [1, 0], sizes = [1, 16], strides = [1, 1]} : vector<16x16xf32> to vector<1x16xf32>
    %316 = vector.extract_strided_slice %313 {offsets = [2, 0], sizes = [1, 16], strides = [1, 1]} : vector<16x16xf32> to vector<1x16xf32>
    %317 = vector.extract_strided_slice %313 {offsets = [3, 0], sizes = [1, 16], strides = [1, 1]} : vector<16x16xf32> to vector<1x16xf32>
    %318 = vector.extract_strided_slice %313 {offsets = [4, 0], sizes = [1, 16], strides = [1, 1]} : vector<16x16xf32> to vector<1x16xf32>
    %319 = vector.extract_strided_slice %313 {offsets = [5, 0], sizes = [1, 16], strides = [1, 1]} : vector<16x16xf32> to vector<1x16xf32>
    %320 = vector.extract_strided_slice %313 {offsets = [6, 0], sizes = [1, 16], strides = [1, 1]} : vector<16x16xf32> to vector<1x16xf32>
    %321 = vector.extract_strided_slice %313 {offsets = [7, 0], sizes = [1, 16], strides = [1, 1]} : vector<16x16xf32> to vector<1x16xf32>
    %322 = vector.extract_strided_slice %313 {offsets = [8, 0], sizes = [1, 16], strides = [1, 1]} : vector<16x16xf32> to vector<1x16xf32>
    %323 = vector.extract_strided_slice %313 {offsets = [9, 0], sizes = [1, 16], strides = [1, 1]} : vector<16x16xf32> to vector<1x16xf32>
    %324 = vector.broadcast %315 : vector<1x16xf32> to vector<4x16xf32>
    %325 = arith.mulf %324, %312 : vector<4x16xf32>
    %326 = vector.broadcast %316 : vector<1x16xf32> to vector<4x16xf32>
    %327 = arith.addf %325, %326 : vector<4x16xf32>
    %328 = arith.negf %327 : vector<4x16xf32>
    %329 = math.exp %328 : vector<4x16xf32>
    %cst_86 = arith.constant 1.000000e+00 : f32
    %330 = vector.broadcast %cst_86 : f32 to vector<4x16xf32>
    %331 = arith.addf %330, %329 : vector<4x16xf32>
    %332 = arith.divf %330, %331 : vector<4x16xf32>
    %333 = vector.broadcast %314 : vector<1x16xf32> to vector<4x16xf32>
    %334 = arith.mulf %333, %332 : vector<4x16xf32>
    %335 = vector.broadcast %317 : vector<1x16xf32> to vector<4x16xf32>
    %336 = arith.mulf %335, %312 : vector<4x16xf32>
    %337 = arith.addf %334, %336 : vector<4x16xf32>
    %338 = vector.broadcast %318 : vector<1x16xf32> to vector<4x16xf32>
    %339 = arith.addf %337, %338 : vector<4x16xf32>
    %340 = vector.broadcast %320 : vector<1x16xf32> to vector<4x16xf32>
    %341 = arith.mulf %340, %312 : vector<4x16xf32>
    %342 = vector.broadcast %321 : vector<1x16xf32> to vector<4x16xf32>
    %343 = arith.addf %341, %342 : vector<4x16xf32>
    %344 = arith.negf %343 : vector<4x16xf32>
    %345 = math.exp %344 : vector<4x16xf32>
    %cst_87 = arith.constant 1.000000e+00 : f32
    %346 = vector.broadcast %cst_87 : f32 to vector<4x16xf32>
    %347 = arith.addf %346, %345 : vector<4x16xf32>
    %348 = arith.divf %346, %347 : vector<4x16xf32>
    %349 = vector.broadcast %319 : vector<1x16xf32> to vector<4x16xf32>
    %350 = arith.mulf %349, %348 : vector<4x16xf32>
    %351 = vector.broadcast %322 : vector<1x16xf32> to vector<4x16xf32>
    %352 = arith.mulf %351, %312 : vector<4x16xf32>
    %353 = arith.addf %350, %352 : vector<4x16xf32>
    %354 = vector.broadcast %323 : vector<1x16xf32> to vector<4x16xf32>
    %355 = arith.addf %353, %354 : vector<4x16xf32>
    %356 = arith.subf %116, %339 : vector<4x16xf32>
    %357 = arith.mulf %356, %355 : vector<4x16xf32>
    %358 = arith.addf %357, %339 : vector<4x16xf32>
    %359 = vector.broadcast %49 : vector<1x16xf32> to vector<4x16xf32>
    %360 = arith.subf %358, %359 : vector<4x16xf32>
    %361 = vector.broadcast %85 : vector<1x16xf32> to vector<4x16xf32>
    %362 = arith.divf %360, %361 : vector<4x16xf32>
    %c0_88 = arith.constant 0 : index
    %c0_89 = arith.constant 0 : index
    %363 = vector.load %arg17[%c0_88, %c0_89] : memref<4x16xf32, #tpu.memory_space<vmem>>, vector<4x16xf32>
    tpu.vector_store %arg17[%c0_88, %c0_89], %362 {strides = array<i32>} : memref<4x16xf32, #tpu.memory_space<vmem>>, vector<4x16xf32>,
    %364 = arith.truncf %358 : vector<4x16xf32> to vector<4x16xbf16>
    %c0_90 = arith.constant 0 : index
    %c0_91 = arith.constant 0 : index
    %365 = vector.load %arg7[%c0_90, %c0_91] : memref<16x32xbf16, #tpu.memory_space<vmem>>, vector<16x32xbf16>
    %cst_92 = arith.constant dense<0.000000e+00> : vector<4x32xf32>
    %366 = tpu.matmul %364, %365, %cst_92 {dimension_numbers = #tpu.dot_dimension_numbers<[1], [0], [0], [1], [0, 0, 1, 1], [], []>} : vector<4x16xbf16>, vector<16x32xbf16>, vector<4x32xf32> -> vector<4x32xf32>
    %cst_93 = arith.constant dense<0.000000e+00> : vector<32xf32>
    %367 = vector.multi_reduction <add>, %366, %cst_93 [0] : vector<4x32xf32> to vector<32xf32>
    %368 = vector.shape_cast %367 : vector<32xf32> to vector<1x32xf32>
    %cst_94 = arith.constant 2.500000e-01 : f32
    %369 = vector.broadcast %cst_94 : f32 to vector<1x32xf32>
    %370 = arith.mulf %368, %369 : vector<1x32xf32>
    %371 = vector.broadcast %370 : vector<1x32xf32> to vector<4x32xf32>
    %372 = arith.subf %366, %371 : vector<4x32xf32>
    %373 = arith.mulf %372, %372 : vector<4x32xf32>
    %cst_95 = arith.constant dense<0.000000e+00> : vector<32xf32>
    %374 = vector.multi_reduction <add>, %373, %cst_95 [0] : vector<4x32xf32> to vector<32xf32>
    %375 = vector.shape_cast %374 : vector<32xf32> to vector<1x32xf32>
    %cst_96 = arith.constant 0.333333343 : f32
    %376 = vector.broadcast %cst_96 : f32 to vector<1x32xf32>
    %377 = arith.mulf %375, %376 : vector<1x32xf32>
    %cst_97 = arith.constant 1.000000e-10 : f32
    %378 = vector.broadcast %cst_97 : f32 to vector<1x32xf32>
    %379 = arith.addf %377, %378 : vector<1x32xf32>
    %380 = math.rsqrt %379 : vector<1x32xf32>
    %381 = vector.broadcast %380 : vector<1x32xf32> to vector<4x32xf32>
    %382 = arith.mulf %372, %381 : vector<4x32xf32>
    %c0_98 = arith.constant 0 : index
    %c0_99 = arith.constant 0 : index
    %383 = vector.load %arg9[%c0_98, %c0_99] : memref<16x32xf32, #tpu.memory_space<vmem>>, vector<16x32xf32>
    %384 = vector.extract_strided_slice %383 {offsets = [0, 0], sizes = [1, 32], strides = [1, 1]} : vector<16x32xf32> to vector<1x32xf32>
    %385 = vector.extract_strided_slice %383 {offsets = [1, 0], sizes = [1, 32], strides = [1, 1]} : vector<16x32xf32> to vector<1x32xf32>
    %386 = vector.extract_strided_slice %383 {offsets = [2, 0], sizes = [1, 32], strides = [1, 1]} : vector<16x32xf32> to vector<1x32xf32>
    %387 = vector.extract_strided_slice %383 {offsets = [3, 0], sizes = [1, 32], strides = [1, 1]} : vector<16x32xf32> to vector<1x32xf32>
    %388 = vector.extract_strided_slice %383 {offsets = [4, 0], sizes = [1, 32], strides = [1, 1]} : vector<16x32xf32> to vector<1x32xf32>
    %389 = vector.extract_strided_slice %383 {offsets = [5, 0], sizes = [1, 32], strides = [1, 1]} : vector<16x32xf32> to vector<1x32xf32>
    %390 = vector.extract_strided_slice %383 {offsets = [6, 0], sizes = [1, 32], strides = [1, 1]} : vector<16x32xf32> to vector<1x32xf32>
    %391 = vector.extract_strided_slice %383 {offsets = [7, 0], sizes = [1, 32], strides = [1, 1]} : vector<16x32xf32> to vector<1x32xf32>
    %392 = vector.extract_strided_slice %383 {offsets = [8, 0], sizes = [1, 32], strides = [1, 1]} : vector<16x32xf32> to vector<1x32xf32>
    %393 = vector.extract_strided_slice %383 {offsets = [9, 0], sizes = [1, 32], strides = [1, 1]} : vector<16x32xf32> to vector<1x32xf32>
    %394 = vector.broadcast %385 : vector<1x32xf32> to vector<4x32xf32>
    %395 = arith.mulf %394, %382 : vector<4x32xf32>
    %396 = vector.broadcast %386 : vector<1x32xf32> to vector<4x32xf32>
    %397 = arith.addf %395, %396 : vector<4x32xf32>
    %398 = arith.negf %397 : vector<4x32xf32>
    %399 = math.exp %398 : vector<4x32xf32>
    %cst_100 = arith.constant 1.000000e+00 : f32
    %400 = vector.broadcast %cst_100 : f32 to vector<4x32xf32>
    %401 = arith.addf %400, %399 : vector<4x32xf32>
    %402 = arith.divf %400, %401 : vector<4x32xf32>
    %403 = vector.broadcast %384 : vector<1x32xf32> to vector<4x32xf32>
    %404 = arith.mulf %403, %402 : vector<4x32xf32>
    %405 = vector.broadcast %387 : vector<1x32xf32> to vector<4x32xf32>
    %406 = arith.mulf %405, %382 : vector<4x32xf32>
    %407 = arith.addf %404, %406 : vector<4x32xf32>
    %408 = vector.broadcast %388 : vector<1x32xf32> to vector<4x32xf32>
    %409 = arith.addf %407, %408 : vector<4x32xf32>
    %410 = vector.broadcast %390 : vector<1x32xf32> to vector<4x32xf32>
    %411 = arith.mulf %410, %382 : vector<4x32xf32>
    %412 = vector.broadcast %391 : vector<1x32xf32> to vector<4x32xf32>
    %413 = arith.addf %411, %412 : vector<4x32xf32>
    %414 = arith.negf %413 : vector<4x32xf32>
    %415 = math.exp %414 : vector<4x32xf32>
    %cst_101 = arith.constant 1.000000e+00 : f32
    %416 = vector.broadcast %cst_101 : f32 to vector<4x32xf32>
    %417 = arith.addf %416, %415 : vector<4x32xf32>
    %418 = arith.divf %416, %417 : vector<4x32xf32>
    %419 = vector.broadcast %389 : vector<1x32xf32> to vector<4x32xf32>
    %420 = arith.mulf %419, %418 : vector<4x32xf32>
    %421 = vector.broadcast %392 : vector<1x32xf32> to vector<4x32xf32>
    %422 = arith.mulf %421, %382 : vector<4x32xf32>
    %423 = arith.addf %420, %422 : vector<4x32xf32>
    %424 = vector.broadcast %393 : vector<1x32xf32> to vector<4x32xf32>
    %425 = arith.addf %423, %424 : vector<4x32xf32>
    %426 = arith.subf %21, %409 : vector<4x32xf32>
    %427 = arith.mulf %426, %425 : vector<4x32xf32>
    %428 = arith.addf %427, %409 : vector<4x32xf32>
    %cst_102 = arith.constant 1.000000e+00 : f32
    %429 = vector.broadcast %cst_102 : f32 to vector<4x32xf32>
    %430 = arith.divf %428, %429 : vector<4x32xf32>
    %c0_103 = arith.constant 0 : index
    %c0_104 = arith.constant 0 : index
    %431 = vector.load %arg16[%c0_103, %c0_104] : memref<4x32xf32, #tpu.memory_space<vmem>>, vector<4x32xf32>
    tpu.vector_store %arg16[%c0_103, %c0_104], %430 {strides = array<i32>} : memref<4x32xf32, #tpu.memory_space<vmem>>, vector<4x32xf32>,
    return
  }
}

</mosaic_0001>

<bundles_post_ra>
// kernel: tpu_custom_call.1
= control target key start
LH: loop header
LB: loop body
LE: loop exit
PB: predicated region body
PF: predicated region fallthrough
CT: control target
= control target key end

     0   :  { %s2157_s0 = inlined_call_operand.vmem [shape: f32[16,32], index: 0, kind: input, shape index: {}]   ;;  %s2158_s1 = inlined_call_operand.vmem [shape: bf16[32,16], index: 1, kind: input, shape index: {}]   ;;  %s2159_s2 = inlined_call_operand.hbm [shape: bf16[16,10], index: 2, kind: input, shape index: {}]   ;;  %s2160_s3 = inlined_call_operand.vmem [shape: f32[1,16], index: 3, kind: input, shape index: {}]   ;;  %s2161_s4 = inlined_call_operand.hbm [shape: f32[1,10], index: 4, kind: input, shape index: {}]   ;;  %s2162_s5 = inlined_call_operand.hbm [shape: f32[1,16], index: 5, kind: input, shape index: {}]   ;;  %s2163_s6 = inlined_call_operand.hbm [shape: f32[1,10], index: 6, kind: input, shape index: {}]   ;;  %s2164_s7 = inlined_call_operand.hbm [shape: bf16[16,32], index: 7, kind: input, shape index: {}]   ;;  %s2165_s8 = inlined_call_operand.hbm [shape: bf16[10,16], index: 8, kind: input, shape index: {}]   ;;  %s2166_s9 = inlined_call_operand.vmem [shape: f32[16,32], index: 9, kind: input, shape index: {}]   ;;  %s2167_s10 = inlined_call_operand.vmem [shape: f32[16,16], index: 10, kind: input, shape index: {}]   ;;  %s2168_s11 = inlined_call_operand.vmem [shape: f32[16,10], index: 11, kind: input, shape index: {}]   ;;  %s2169_s12 = inlined_call_operand.hbm [shape: f32[16,16], index: 12, kind: input, shape index: {}]   ;;  %s2170_s13 = inlined_call_operand.hbm [shape: f32[16,10], index: 13, kind: input, shape index: {}]   ;;  %s2171_s14 = inlined_call_operand.hbm [shape: f32[8,10], index: 14, kind: output, shape index: {0}]   ;;  %s2172_s15 = inlined_call_operand.hbm [shape: f32[8,10], index: 15, kind: output, shape index: {1}]   ;;  %s2173_s16 = inlined_call_operand.hbm [shape: f32[4,32], index: 16, kind: output, shape index: {2}]   ;;  %s2174_s17 = inlined_call_operand.hbm [shape: f32[4,16], index: 17, kind: output, shape index: {3}]   ;;  %s2175_s18 = inlined_call_operand.hbm [shape: f32[4,10], index: 18, kind: output, shape index: {4}]  }
   0x1   :  { %2179 = sst [smem:[#allocation31_spill]] %s2157_s0 }
   0x2   :  { %2180 = sst [smem:[#allocation32_spill]] %s2158_s1 }
   0x3   :  { %2181 = sst [smem:[#allocation33_spill]] %s2159_s2 }
   0x4   :  { %24 = vsyncpa [#allocation3], 0 }
   0x5   :  { %25 = vsyncpa [#allocation6], 0 }
   0x6   :  { %26 = vsyncpa [#allocation9], 0 }
   0x7   :  { %27 = vsyncpa [#allocation12], 0 }
   0x8   :  { %28 = vsyncpa [#allocation15], 0 }
   0x9   :  { %29 = vsyncpa [#allocation4], 0 }
   0xa   :  { %30 = vsyncpa [#allocation18], 0 }
   0xb   :  { %31 = vsyncpa [#allocation21], 0  ;;  %s1567_s25 = smov [#allocation5]   ;;  %s1568_s27 = smov [#allocation8]  }
   0xc   :  { %s56_s26 = sshll.u32 %s1567_s25, 4  ;;  %s76_s28 = sshll.u32 %s1568_s27, 4  ;;  %s57_s26 = int_to_ptr.vmem [resolvable:$true] %s56_s26  ;;  %s77_s28 = int_to_ptr.vmem [resolvable:$true] %s76_s28 }
   0xd   :  { %s1265_s30 = scalar_lea.hbm %s2161_s4, 16 }
   0xe   :  { %p1266_p0 = scmp.ne.s32.totalorder %s2161_s4, %s1265_s30  ;;  %p1269_p1 = scmp.lt.u32.totalorder %s1265_s30, %s2161_s4 }
  0x10   :  { %p1271_p2 = pnand %p1269_p1, %p1266_p0 }
  0x12   :  { %1274 = shalt.err (!%p1271_p2)
}
  0x13   :  { %s1275_s2 = scalar_lea.vmem %s57_s26, 16  ;;  %s1279_s22 = scalar_lea.vmem %s57_s26, 32 }
  0x14   :  { %p1276_p3 = scmp.ne.s32.totalorder %s57_s26, %s1275_s2  ;;  %p1280_p4 = scmp.lt.s32.totalorder %s57_s26, %s57_s26 }
  0x15   :  { %p1281_p5 = scmp.lt.s32.totalorder %s1279_s22, %s1275_s2 }
  0x17   :  { %p1282_p6 = por %p1281_p5, %p1280_p4 }
  0x19   :  { %p1283_p7 = pnand %p1282_p6, %p1276_p3 }
  0x1b   :  { %1286 = shalt.err (!%p1283_p7)
}
  0x1c   :  { %59 = dma.hbm_to_vmem [thread:$0]  %s2161_s4, 16, %s57_s26, [#allocation6]  }
  0x1d   :  { %s1287_s27 = scalar_lea.hbm %s2163_s6, 16 }
  0x1e   :  { %p1288_p8 = scmp.ne.s32.totalorder %s2163_s6, %s1287_s27  ;;  %p1291_p9 = scmp.lt.u32.totalorder %s1287_s27, %s2163_s6 }
  0x20   :  { %p1293_p10 = pnand %p1291_p9, %p1288_p8 }
  0x22   :  { %1296 = shalt.err (!%p1293_p10)
}
  0x23   :  { %s1297_s19 = scalar_lea.vmem %s77_s28, 16  ;;  %s1301_s20 = scalar_lea.vmem %s77_s28, 32 }
  0x24   :  { %p1298_p11 = scmp.ne.s32.totalorder %s77_s28, %s1297_s19  ;;  %p1302_p12 = scmp.lt.s32.totalorder %s77_s28, %s77_s28 }
  0x25   :  { %p1303_p13 = scmp.lt.s32.totalorder %s1301_s20, %s1297_s19 }
  0x27   :  { %p1304_p0 = por %p1303_p13, %p1302_p12 }
  0x29   :  { %p1305_p1 = pnand %p1304_p0, %p1298_p11 }
  0x2b   :  { %1308 = shalt.err (!%p1305_p1)
}
  0x2c   :  { %79 = dma.hbm_to_vmem [thread:$0]  %s2163_s6, 16, %s77_s28, [#allocation9]  }
  0x2d   :  { %s1569_s21 = smov [#allocation11]   ;;  %s1570_s22 = smov [#allocation2]  }
  0x2e   :  { %s97_s2 = sshll.u32 %s1569_s21, 4  ;;  %s41_s23 = sshll.u32 %s1570_s22, 4  ;;  %s98_s2 = int_to_ptr.vmem [resolvable:$true] %s97_s2  ;;  %s1705_s23 = int_to_ptr.vmem [resolvable:$true] %s41_s23 }
  0x2f   :  { %s1309_s25 = scalar_lea.hbm %s2165_s8, 128 }
  0x30   :  { %p1310_p2 = scmp.ne.s32.totalorder %s2165_s8, %s1309_s25  ;;  %p1313_p3 = scmp.lt.u32.totalorder %s1309_s25, %s2165_s8 }
  0x32   :  { %p1315_p4 = pnand %p1313_p3, %p1310_p2 }
  0x34   :  { %1318 = shalt.err (!%p1315_p4)
}
  0x35   :  { %s1319_s6 = scalar_lea.vmem %s98_s2, 128  ;;  %p1324_p6 = scmp.lt.s32.totalorder %s98_s2, %s98_s2 }
  0x36   :  { %p1320_p5 = scmp.ne.s32.totalorder %s98_s2, %s1319_s6  ;;  %p1325_p7 = scmp.lt.s32.totalorder %s1319_s6, %s1319_s6 }
  0x38   :  { %p1326_p8 = por %p1325_p7, %p1324_p6 }
  0x3a   :  { %p1327_p9 = pnand %p1326_p8, %p1320_p5 }
  0x3c   :  { %1330 = shalt.err (!%p1327_p9)
}
  0x3d   :  { %s1571_s28 = smov 64   ;;  %s1572_s1 = smov 4  }
  0x3e   :  { %103 = dma.hbm_to_vmem [thread:$0]  %s2165_s8, 128, %s98_s2, [#allocation12], %s1571_s28, %s1571_s28, %s1572_s1  }
  0x3f   :  { %s2182_s21 = sld [smem:[#allocation33_spill]] }
  0x45   :  { %s1331_s22 = scalar_lea.hbm %s2182_s21, 128 }
  0x46   :  { %p1332_p10 = scmp.ne.s32.totalorder %s2182_s21, %s1331_s22  ;;  %p1335_p11 = scmp.lt.u32.totalorder %s1331_s22, %s2182_s21 }
  0x48   :  { %p1337_p12 = pnand %p1335_p11, %p1332_p10 }
  0x4a   :  { %1340 = shalt.err (!%p1337_p12)
}
  0x4b   :  { %s1341_s29 = scalar_lea.vmem %s1705_s23, 128  ;;  %p1346_p0 = scmp.lt.s32.totalorder %s1705_s23, %s1705_s23 }
  0x4c   :  { %p1342_p13 = scmp.ne.s32.totalorder %s1705_s23, %s1341_s29  ;;  %p1347_p1 = scmp.lt.s32.totalorder %s1341_s29, %s1341_s29 }
  0x4e   :  { %p1348_p2 = por %p1347_p1, %p1346_p0 }
  0x50   :  { %p1349_p3 = pnand %p1348_p2, %p1342_p13 }
  0x52   :  { %1352 = shalt.err (!%p1349_p3)
}
  0x53   :  { %47 = dma.hbm_to_vmem [thread:$0]  %s2182_s21, 128, %s1705_s23, [#allocation3], %s1571_s28, %s1571_s28, %s1572_s1  }
  0x54   :  { %s1573_s0 = smov [#allocation7]   ;;  %s1574_s6 = smov [#allocation10]  }
  0x55   :  { %s66_s30 = sshll.u32 %s1573_s0, 4  ;;  %s85_s19 = sshll.u32 %s1574_s6, 4  ;;  %s67_s30 = int_to_ptr.vmem [resolvable:$true] %s66_s30  ;;  %s1742_s19 = int_to_ptr.vmem [resolvable:$true] %s85_s19 }
  0x56   :  { %s1353_s26 = scalar_lea.hbm %s2162_s5, 16 }
  0x57   :  { %p1354_p4 = scmp.ne.s32.totalorder %s2162_s5, %s1353_s26  ;;  %p1357_p5 = scmp.lt.u32.totalorder %s1353_s26, %s2162_s5 }
  0x59   :  { %p1359_p6 = pnand %p1357_p5, %p1354_p4 }
  0x5b   :  { %1362 = shalt.err (!%p1359_p6)
}
  0x5c   :  { %s1363_s23 = scalar_lea.vmem %s67_s30, 16  ;;  %s1367_s21 = scalar_lea.vmem %s67_s30, 32 }
  0x5d   :  { %p1364_p7 = scmp.ne.s32.totalorder %s67_s30, %s1363_s23  ;;  %p1368_p8 = scmp.lt.s32.totalorder %s67_s30, %s67_s30 }
  0x5e   :  { %p1369_p9 = scmp.lt.s32.totalorder %s1367_s21, %s1363_s23 }
  0x60   :  { %p1370_p10 = por %p1369_p9, %p1368_p8 }
  0x62   :  { %p1371_p11 = pnand %p1370_p10, %p1364_p7 }
  0x64   :  { %1374 = shalt.err (!%p1371_p11)
}
  0x65   :  { %69 = dma.hbm_to_vmem [thread:$0]  %s2162_s5, 16, %s67_s30, [#allocation6]  }
  0x66   :  { %s1375_s0 = scalar_lea.hbm %s2164_s7, 128 }
  0x67   :  { %p1376_p12 = scmp.ne.s32.totalorder %s2164_s7, %s1375_s0  ;;  %p1379_p13 = scmp.lt.u32.totalorder %s1375_s0, %s2164_s7 }
  0x69   :  { %p1381_p0 = pnand %p1379_p13, %p1376_p12 }
  0x6b   :  { %1384 = shalt.err (!%p1381_p0)
}
  0x6c   :  { %s1385_s22 = scalar_lea.vmem %s1742_s19, 128  ;;  %p1390_p2 = scmp.lt.s32.totalorder %s1742_s19, %s1742_s19 }
  0x6d   :  { %p1386_p1 = scmp.ne.s32.totalorder %s1742_s19, %s1385_s22  ;;  %p1391_p3 = scmp.lt.s32.totalorder %s1385_s22, %s1385_s22 }
  0x6f   :  { %p1392_p4 = por %p1391_p3, %p1390_p2 }
  0x71   :  { %p1393_p5 = pnand %p1392_p4, %p1386_p1 }
  0x73   :  { %1396 = shalt.err (!%p1393_p5)
}
  0x74   :  { %91 = dma.hbm_to_vmem [thread:$0]  %s2164_s7, 128, %s1742_s19, [#allocation9], %s1571_s28, %s1571_s28, %s1572_s1  }
  0x75   :  { %s1575_s24 = smov [#allocation13]   ;;  %s1397_s21 = scalar_lea.hbm %s2169_s12, 256 }
  0x76   :  { %s115_s3 = sshll.u32 %s1575_s24, 4  ;;  %p1398_p6 = scmp.ne.s32.totalorder %s2169_s12, %s1397_s21  ;;  %s116_s3 = int_to_ptr.vmem [resolvable:$true] %s115_s3 }
  0x77   :  { %p1401_p7 = scmp.lt.u32.totalorder %s1397_s21, %s2169_s12 }
  0x79   :  { %p1403_p8 = pnand %p1401_p7, %p1398_p6 }
  0x7b   :  { %1406 = shalt.err (!%p1403_p8)
}
  0x7c   :  { %s1407_s0 = scalar_lea.vmem %s116_s3, 256  ;;  %p1412_p10 = scmp.lt.s32.totalorder %s116_s3, %s116_s3 }
  0x7d   :  { %p1408_p9 = scmp.ne.s32.totalorder %s116_s3, %s1407_s0  ;;  %p1413_p11 = scmp.lt.s32.totalorder %s1407_s0, %s1407_s0 }
  0x7f   :  { %p1414_p12 = por %p1413_p11, %p1412_p10 }
  0x81   :  { %p1415_p13 = pnand %p1414_p12, %p1408_p9 }
  0x83   :  { %1418 = shalt.err (!%p1415_p13)
}
  0x84   :  { %s1576_s7 = smov 128   ;;  %s1577_s28 = smov 8  }
  0x85   :  { %121 = dma.hbm_to_vmem [thread:$0]  %s2169_s12, 256, %s116_s3, [#allocation12], %s1576_s7, %s1576_s7, %s1577_s28  }
  0x86   :  { %s1578_s6 = smov [#allocation14]   ;;  %s1419_s22 = scalar_lea.hbm %s2170_s13, 256 }
  0x87   :  { %s127_s20 = sshll.u32 %s1578_s6, 4  ;;  %p1420_p0 = scmp.ne.s32.totalorder %s2170_s13, %s1419_s22  ;;  %s128_s20 = int_to_ptr.vmem [resolvable:$true] %s127_s20 }
  0x88   :  { %p1423_p1 = scmp.lt.u32.totalorder %s1419_s22, %s2170_s13 }
  0x8a   :  { %p1425_p2 = pnand %p1423_p1, %p1420_p0 }
  0x8c   :  { %1428 = shalt.err (!%p1425_p2)
}
  0x8d   :  { %s1429_s23 = scalar_lea.vmem %s128_s20, 256  ;;  %p1434_p4 = scmp.lt.s32.totalorder %s128_s20, %s128_s20 }
  0x8e   :  { %p1430_p3 = scmp.ne.s32.totalorder %s128_s20, %s1429_s23  ;;  %p1435_p5 = scmp.lt.s32.totalorder %s1429_s23, %s1429_s23 }
  0x90   :  { %p1436_p6 = por %p1435_p5, %p1434_p4 }
  0x92   :  { %p1437_p7 = pnand %p1436_p6, %p1430_p3 }
  0x94   :  { %1440 = shalt.err (!%p1437_p7)
}
  0x95   :  { %133 = dma.hbm_to_vmem [thread:$0]  %s2170_s13, 256, %s128_s20, [#allocation15], %s1576_s7, %s1576_s7, %s1577_s28  }
  0x96   :  { %1551 = dma.done.wait [#allocation3], 128  }
  0x97   :  { %1552 = vsyncadd [#allocation3], 4294967168 }
  0x98   :  { %1553 = dma.done.wait [#allocation6], 32  }
  0x99   :  { %1554 = vsyncadd [#allocation6], 4294967264 }
  0x9a   :  { %1555 = dma.done.wait [#allocation9], 144  }
  0x9b   :  { %1556 = vsyncadd [#allocation9], 4294967152 }
  0x9c   :  { %1557 = dma.done.wait [#allocation12], 384  }
  0x9d   :  { %1558 = vsyncadd [#allocation12], 4294966912 }
  0x9e   :  { %1559 = dma.done.wait [#allocation15], 256  }
  0x9f   :  { %1560 = vsyncadd [#allocation15], 4294967040  ;;  %v1579_v0 = vmov 0.0   ;;  %vm1580_vm0 = vmmov 0   ;;  %s2183_s27 = sld [smem:[#allocation32_spill]]  ;;  %s2184_s7 = sld [smem:[#allocation31_spill]]  ;;  %v161_v7 = vlaneseq }
  0xa0   :  { %1156 = vmatprep.subr.bf16.mxu0 %v1579_v0  ;;  %1160 = vmatprep.mubr.msk.bf16.mxu0 %vm1580_vm0, %v1579_v0  ;;  %vm209_vm1 = vcmask 261120   ;;  %v1203_v6 = vld [vmem:[#allocation2] sm:$0xff]   ;;  %vm254_vm4 = vcmask 130048   ;;  %vm458_vm5 = vcmask 80896   ;;  %vm755_vm6 = vcmask 1044480   ;;  %s1582_s24 = smov [#allocation20]  }
  0xa1   :  { %1164 = vmatprep.subr.bf16.mxu1 %v1579_v0  ;;  %1166 = vmatprep.mubr.msk.bf16.mxu1 %vm1580_vm0, %v1579_v0  ;;  %v1823_v8 = vshrl.u32 %v161_v7, 7  ;;  %vm643_vm7 = vcmask 76800   ;;  %vm740_vm8 = vcmask 80900   ;;  %vm799_vm9 = vcmask 125952   ;;  %s1090_s25 = sshll.u32 %s1582_s24, 4  ;;  %s1091_s25 = int_to_ptr.vmem [resolvable:$true] %s1090_s25 }
  0xa2   :  { %1165 = vmatpush3.bf16.msra.mxu1 %v1203_v6  ;;  %vm899_vm10 = vcmask 130052  }
  0xa3   :  { %1170 = vmatprep.subr.bf16.mxu1 %v1579_v0  ;;  %v163_v9 = vadd.s32 8, %v1823_v8  ;;  %vm170_vm2 = vcmp.lt.s32.totalorder %v1823_v8, 4 }
  0xa4   :  { %v1828_v10 = vsel %vm170_vm2, 1.0, %v1579_v0 }
  0xa5   :  { %v1201_v1 = vld [vmem:[%s2183_s27] sm:$0xff]   ;;  %v1202_v2 = vld [vmem:[%s2183_s27 + $0x8] sm:$0xff]   ;;  %vm179_vm3 = vcmp.lt.s32.totalorder %v163_v9, 12  ;;  %v186_v57 = vsub.f32 1.0, %v1828_v10 }
  0xa6   :  { %1157 = vmatpush3.bf16.msra.mxu0 %v1201_v1  ;;  %v159_v3 = vld [vmem:[%s2184_s7] sm:$0xff]  ;;  %v160_v4 = vld [vmem:[%s2184_s7 + $0x8] sm:$0xff]  ;;  %v1836_v15 = vsel %vm179_vm3, 1.0, %v1579_v0 }
  0xa7   :  { %1158 = vmatprep.subr.bf16.mxu0 %v1579_v0  ;;  %v192_v5 = vpack.c.bf16 %v160_v4, %v159_v3  ;;  %v191_v63 = vsub.f32 1.0, %v1836_v15 }
  0xaa   :  { %1159 = vmatpush3.bf16.msra.mxu0 %v1202_v2 }
  0xab   :  { %1176 = vmatprep.subr.bf16.mxu0 %v1579_v0 }
  0xad   :  { %1161 = vmatmul.mubr.msk.bf16.vlgmr.msra.gmra.mrb[0].mxu0 %vm209_vm1, %v192_v5 }
  0xae   :  { %1178 = vmatprep.mubr.msk.bf16.mxu0 %vm1580_vm0, %v1579_v0 }
 0x180   :  { %v1830_v11 = vpop.f32.mrb[0].mxu0 }
 0x181   :  { %v275_v12 = vmul.f32 %v1828_v10, %v1830_v11  ;;  %v286_v13 = vmul.f32 0.0, %v1830_v11  ;;  %v1162_v14 = vpop.f32.mrb[1].mxu0  ;;  %v255_v17 = vsel %vm254_vm4, %v1830_v11, 0.0 }
 0x182   :  { %v1838_v16 = vpop.f32.mrb[2].mxu0 }
 0x183   :  { %v256_v18 = vsel %vm254_vm4, %v1838_v16, 0.0  ;;  %v265_v19 = vmul.f32 0.0, %v1838_v16  ;;  %v1163_v20 = vpop.f32.mrb[3].mxu0  ;;  %v287_v22 = vmul.f32 %v1836_v15, %v1838_v16  ;;  %v277_v23 = vsel %vm254_vm4, %v275_v12, 0.0 }
 0x184   :  { %v257_v21 = vadd.f32 %v256_v18, %v255_v17  ;;  %v288_v24 = vsel %vm254_vm4, %v286_v13, 0.0 }
 0x185   :  { %v267_v25 = vsel %vm254_vm4, %v265_v19, 0.0  ;;  %v289_v29 = vsel %vm254_vm4, %v287_v22, 0.0 }
 0x186   :  { %v258_v26 = vrot.slane %v257_v21, 4  ;;  %v268_v27 = vadd.f32 %v267_v25, %v255_v17  ;;  %v279_v28 = vadd.f32 %v277_v23, %v267_v25  ;;  %v290_v30 = vadd.f32 %v289_v29, %v288_v24 }
 0x188   :  { %v259_v31 = vadd.f32 %v258_v26, %v257_v21  ;;  %v269_v32 = vrot.slane %v268_v27, 4  ;;  %v280_v33 = vrot.slane %v279_v28, 4  ;;  %v291_v34 = vrot.slane %v290_v30, 4 }
 0x18a   :  { %v260_v35 = vrot.slane %v259_v31, 2  ;;  %v270_v36 = vadd.f32 %v269_v32, %v268_v27  ;;  %v281_v37 = vadd.f32 %v280_v33, %v279_v28  ;;  %v292_v38 = vadd.f32 %v291_v34, %v290_v30 }
 0x18c   :  { %v261_v39 = vadd.f32 %v260_v35, %v259_v31  ;;  %v271_v40 = vrot.slane %v270_v36, 2  ;;  %v282_v41 = vrot.slane %v281_v37, 2  ;;  %v293_v42 = vrot.slane %v292_v38, 2 }
 0x18e   :  { %v262_v43 = vrot.slane %v261_v39, 1  ;;  %v272_v44 = vadd.f32 %v271_v40, %v270_v36  ;;  %v283_v45 = vadd.f32 %v282_v41, %v281_v37  ;;  %v294_v46 = vadd.f32 %v293_v42, %v292_v38 }
 0x190   :  { %v273_v47 = vrot.slane %v272_v44, 1  ;;  %v284_v48 = vrot.slane %v283_v45, 1  ;;  %v295_v49 = vrot.slane %v294_v46, 1  ;;  %v263_v50 = vadd.f32 %v262_v43, %v261_v39 }
 0x192   :  { %v274_v51 = vadd.f32 %v273_v47, %v272_v44  ;;  %v285_v52 = vadd.f32 %v284_v48, %v283_v45  ;;  %v296_v53 = vadd.f32 %v295_v49, %v294_v46 }
 0x194   :  { %v297_v54 = vmul.f32 0.25, %v285_v52  ;;  %v298_v55 = vsub.f32 %v274_v51, %v285_v52  ;;  %v301_v56 = vsub.f32 %v263_v50, %v274_v51  ;;  %v300_v58 = vmul.f32 0.25, %v296_v53 }
 0x196   :  { %v299_v59 = vmul.f32 0.25, %v298_v55  ;;  %v302_v60 = vsub.f32 %v301_v56, %v296_v53  ;;  %v304_v61 = vsub.f32 %v1830_v11, %v297_v54  ;;  %v305_v62 = vsub.f32 %v1838_v16, %v297_v54 }
 0x197   :  { %v312_v1 = vsub.f32 %v1830_v11, %v300_v58  ;;  %v313_v2 = vsub.f32 %v1838_v16, %v300_v58 }
 0x198   :  { %v1857_v3 = vmul.f32 0.25, %v302_v60  ;;  %v1860_v4 = vmul.f32 %v1828_v10, %v304_v61  ;;  %v1862_v5 = vmul.f32 0.0, %v305_v62  ;;  %v308_v6 = vsub.f32 %v1830_v11, %v299_v59 }
 0x199   :  { %v309_v7 = vsub.f32 %v1838_v16, %v299_v59  ;;  %v1867_v9 = vmul.f32 %v1836_v15, %v313_v2  ;;  %v1869_v12 = vmul.f32 0.0, %v312_v1 }
 0x19a   :  { %v1873_v13 = vmul.f32 %v308_v6, %v186_v57  ;;  %v317_v14 = vsub.f32 %v1838_v16, %v1857_v3  ;;  %v320_v17 = vmul.f32 %v1860_v4, %v1860_v4  ;;  %v321_v18 = vmul.f32 %v1862_v5, %v1862_v5 }
 0x19b   :  { %v1881_v19 = vmul.f32 0.0, %v309_v7  ;;  %v345_v20 = vmul.f32 %v1867_v9, %v1867_v9  ;;  %v316_v21 = vsub.f32 %v1830_v11, %v1857_v3  ;;  %v344_v22 = vmul.f32 %v1869_v12, %v1869_v12 }
 0x19c   :  { %v1891_v16 = vmul.f32 %v317_v14, %v191_v63  ;;  %v322_v23 = vsel %vm254_vm4, %v320_v17, 0.0  ;;  %v323_v24 = vsel %vm254_vm4, %v321_v18, 0.0  ;;  %v332_v25 = vmul.f32 %v1873_v13, %v1873_v13 }
 0x19d   :  { %v324_v26 = vadd.f32 %v323_v24, %v322_v23  ;;  %v333_v27 = vmul.f32 %v1881_v19, %v1881_v19  ;;  %v347_v11 = vsel %vm254_vm4, %v345_v20, 0.0  ;;  %v318_v28 = vmul.f32 0.0, %v316_v21 }
 0x19e   :  { %v334_v29 = vsel %vm254_vm4, %v332_v25, 0.0  ;;  %v357_v30 = vmul.f32 %v1891_v16, %v1891_v16  ;;  %v346_v31 = vsel %vm254_vm4, %v344_v22, 0.0 }
 0x19f   :  { %v325_v32 = vrot.slane %v324_v26, 4  ;;  %v335_v33 = vsel %vm254_vm4, %v333_v27, 0.0  ;;  %v348_v34 = vadd.f32 %v347_v11, %v346_v31  ;;  %v356_v35 = vmul.f32 %v318_v28, %v318_v28 }
 0x1a0   :  { %v336_v36 = vadd.f32 %v335_v33, %v334_v29  ;;  %v359_v37 = vsel %vm254_vm4, %v357_v30, 0.0 }
 0x1a1   :  { %v326_v38 = vadd.f32 %v325_v32, %v324_v26  ;;  %v349_v39 = vrot.slane %v348_v34, 4  ;;  %v358_v40 = vsel %vm254_vm4, %v356_v35, 0.0 }
 0x1a2   :  { %v337_v41 = vrot.slane %v336_v36, 4  ;;  %v360_v42 = vadd.f32 %v359_v37, %v358_v40  ;;  %v390_v37 = vld [vmem:[#allocation13] sm:$0xff]  ;;  %v1132_v40 = vld [vmem:[#allocation7] ss:$0 sm:$0xff] }
 0x1a3   :  { %v327_v43 = vrot.slane %v326_v38, 2  ;;  %v350_v44 = vadd.f32 %v349_v39, %v348_v34 }
 0x1a4   :  { %v338_v45 = vadd.f32 %v337_v41, %v336_v36  ;;  %v361_v46 = vrot.slane %v360_v42, 4 }
 0x1a5   :  { %v328_v47 = vadd.f32 %v327_v43, %v326_v38  ;;  %v351_v48 = vrot.slane %v350_v44, 2 }
 0x1a6   :  { %v339_v49 = vrot.slane %v338_v45, 2  ;;  %v362_v50 = vadd.f32 %v361_v46, %v360_v42 }
 0x1a7   :  { %v329_v51 = vrot.slane %v328_v47, 1  ;;  %v352_v52 = vadd.f32 %v351_v48, %v350_v44 }
 0x1a8   :  { %v340_v53 = vadd.f32 %v339_v49, %v338_v45  ;;  %v363_v54 = vrot.slane %v362_v50, 2 }
 0x1a9   :  { %v330_v55 = vadd.f32 %v329_v51, %v328_v47  ;;  %v353_v56 = vrot.slane %v352_v52, 1 }
 0x1aa   :  { %v341_v58 = vrot.slane %v340_v53, 1  ;;  %v364_v59 = vadd.f32 %v363_v54, %v362_v50 }
 0x1ab   :  { %v331_v60 = vmul.f32 0.33333334, %v330_v55  ;;  %v354_v61 = vadd.f32 %v353_v56, %v352_v52 }
 0x1ac   :  { %v342_v62 = vadd.f32 %v341_v58, %v340_v53  ;;  %v365_v1 = vrot.slane %v364_v59, 1 }
 0x1ad   :  { %v368_v2 = vadd.f32 1e-10, %v331_v60  ;;  %v355_v6 = vmul.f32 0.25, %v354_v61 }
 0x1ae   :  { %v343_v7 = vmul.f32 0.33333334, %v342_v62  ;;  %v366_v14 = vadd.f32 %v365_v1, %v364_v59 }
 0x1af   :  { %1206 = vrsqrt.f32 %v368_v2  ;;  %v378_v17 = vadd.f32 1e-10, %v355_v6 }
 0x1b0   :  { %v372_v18 = vadd.f32 1e-10, %v343_v7  ;;  %v1907_v20 = vmul.f32 0.33333334, %v366_v14 }
 0x1b1   :  { %1208 = vrsqrt.f32 %v378_v17 }
 0x1b2   :  { %1210 = vrsqrt.f32 %v372_v18  ;;  %v384_v21 = vadd.f32 1e-10, %v1907_v20 }
 0x1b4   :  { %1212 = vrsqrt.f32 %v384_v21 }
 0x1b9   :  { %v1207_v22 = vpop.eup %1206 }
 0x1ba   :  { %v371_v23 = vmul.f32 %v1207_v22, %v1862_v5  ;;  %v370_v24 = vmul.f32 %v1207_v22, %v1860_v4  ;;  %v391_v4 = vld [vmem:[#allocation13 + $0x8] sm:$0xff] }
 0x1bb   :  { %v1209_v25 = vpop.eup %1208 }
 0x1bc   :  { %v1211_v26 = vpop.eup %1210  ;;  %v380_v27 = vmul.f32 %v1209_v25, %v1869_v12  ;;  %v381_v11 = vmul.f32 %v1209_v25, %v1867_v9 }
 0x1bd   :  { %v375_v29 = vmul.f32 %v1211_v26, %v1881_v19  ;;  %v374_v30 = vmul.f32 %v1211_v26, %v1873_v13 }
 0x1be   :  { %v1213_v31 = vpop.eup %1212 }
 0x1bf   :  { %v376_v32 = vadd.f32 %v374_v30, %v370_v24  ;;  %v377_v33 = vadd.f32 %v375_v29, %v371_v23  ;;  %v386_v34 = vmul.f32 %v1213_v31, %v318_v28  ;;  %v387_v35 = vmul.f32 %v1213_v31, %v1891_v16 }
 0x1c1   :  { %v382_v36 = vadd.f32 %v380_v27, %v376_v32  ;;  %v383_v5 = vadd.f32 %v381_v11, %v377_v33 }
 0x1c3   :  { %v388_v38 = vadd.f32 %v386_v34, %v382_v36  ;;  %v389_v39 = vadd.f32 %v387_v35, %v383_v5 }
 0x1c5   :  { %v1917_v12 = vadd.f32 %v390_v37, %v388_v38  ;;  %v393_v9 = vadd.f32 %v391_v4, %v389_v39 }
 0x1c7   :  { %v401_v19 = vadd.f32 %v1132_v40, %v1917_v12  ;;  %v402_v41 = vadd.f32 %v1132_v40, %v393_v9 }
 0x1c9   :  { %v403_v13 = vmax.f32 %v401_v19, 0.0  ;;  %v404_v42 = vmax.f32 %v402_v41, 0.0 }
 0x1cb   :  { %v405_v43 = vpack.c.bf16 %v404_v42, %v403_v13 }
 0x1cd   :  { %1167 = vmatmul.mubr.msk.bf16.vlgmr.msra.gmra.mrb[0].mxu1 %vm254_vm4, %v405_v43 }
 0x1ce   :  { %1172 = vmatprep.mubr.msk.bf16.mxu1 %vm1580_vm0, %v1579_v0 }
 0x2a0   :  { %v1923_v16 = vpop.f32.mrb[0].mxu1 }
 0x2a1   :  { %v479_v28 = vmul.f32 %v1828_v10, %v1923_v16  ;;  %v490_v44 = vmul.f32 0.0, %v1923_v16  ;;  %v1168_v45 = vpop.f32.mrb[1].mxu1  ;;  %v459_v47 = vsel %vm458_vm5, %v1923_v16, 0.0 }
 0x2a2   :  { %v1928_v46 = vpop.f32.mrb[2].mxu1 }
 0x2a3   :  { %v460_v48 = vsel %vm458_vm5, %v1928_v46, 0.0  ;;  %v469_v49 = vmul.f32 0.0, %v1928_v46  ;;  %v1169_v0 = vpop.f32.mrb[3].mxu1  ;;  %v491_v51 = vmul.f32 %v1836_v15, %v1928_v46  ;;  %v481_v52 = vsel %vm458_vm5, %v479_v28, 0.0 }
 0x2a4   :  { %v461_v50 = vadd.f32 %v460_v48, %v459_v47  ;;  %v492_v53 = vsel %vm458_vm5, %v490_v44, 0.0 }
 0x2a5   :  { %v471_v54 = vsel %vm458_vm5, %v469_v49, 0.0  ;;  %v493_v59 = vsel %vm458_vm5, %v491_v51, 0.0 }
 0x2a6   :  { %v462_v55 = vrot.slane %v461_v50, 4  ;;  %v472_v56 = vadd.f32 %v471_v54, %v459_v47  ;;  %v483_v58 = vadd.f32 %v481_v52, %v471_v54  ;;  %v494_v60 = vadd.f32 %v493_v59, %v492_v53 }
 0x2a8   :  { %v463_v61 = vadd.f32 %v462_v55, %v461_v50  ;;  %v473_v62 = vrot.slane %v472_v56, 4  ;;  %v484_v1 = vrot.slane %v483_v58, 4  ;;  %v495_v2 = vrot.slane %v494_v60, 4 }
 0x2aa   :  { %v464_v6 = vrot.slane %v463_v61, 2  ;;  %v474_v7 = vadd.f32 %v473_v62, %v472_v56  ;;  %v485_v14 = vadd.f32 %v484_v1, %v483_v58  ;;  %v496_v17 = vadd.f32 %v495_v2, %v494_v60 }
 0x2ac   :  { %v465_v18 = vadd.f32 %v464_v6, %v463_v61  ;;  %v475_v21 = vrot.slane %v474_v7, 2  ;;  %v486_v22 = vrot.slane %v485_v14, 2  ;;  %v497_v23 = vrot.slane %v496_v17, 2 }
 0x2ae   :  { %v466_v24 = vrot.slane %v465_v18, 1  ;;  %v476_v25 = vadd.f32 %v475_v21, %v474_v7  ;;  %v487_v26 = vadd.f32 %v486_v22, %v485_v14  ;;  %v498_v27 = vadd.f32 %v497_v23, %v496_v17 }
 0x2b0   :  { %v477_v11 = vrot.slane %v476_v25, 1  ;;  %v488_v29 = vrot.slane %v487_v26, 1  ;;  %v499_v30 = vrot.slane %v498_v27, 1  ;;  %v467_v31 = vadd.f32 %v466_v24, %v465_v18 }
 0x2b2   :  { %v478_v32 = vadd.f32 %v477_v11, %v476_v25  ;;  %v489_v33 = vadd.f32 %v488_v29, %v487_v26  ;;  %v500_v34 = vadd.f32 %v499_v30, %v498_v27 }
 0x2b4   :  { %v501_v35 = vmul.f32 0.25, %v489_v33  ;;  %v502_v36 = vsub.f32 %v478_v32, %v489_v33  ;;  %v505_v5 = vsub.f32 %v467_v31, %v478_v32  ;;  %v504_v37 = vmul.f32 0.25, %v500_v34 }
 0x2b6   :  { %v503_v4 = vmul.f32 0.25, %v502_v36  ;;  %v508_v38 = vsub.f32 %v1923_v16, %v501_v35  ;;  %v509_v39 = vsub.f32 %v1928_v46, %v501_v35  ;;  %v506_v40 = vsub.f32 %v505_v5, %v500_v34 }
 0x2b7   :  { %v516_v9 = vsub.f32 %v1923_v16, %v504_v37  ;;  %v517_v19 = vsub.f32 %v1928_v46, %v504_v37 }
 0x2b8   :  { %v1946_v41 = vmul.f32 %v1828_v10, %v508_v38  ;;  %v512_v13 = vsub.f32 %v1923_v16, %v503_v4  ;;  %v513_v42 = vsub.f32 %v1928_v46, %v503_v4  ;;  %v1950_v43 = vmul.f32 0.25, %v506_v40 }
 0x2b9   :  { %v1952_v28 = vmul.f32 0.0, %v516_v9  ;;  %v1954_v44 = vmul.f32 0.0, %v509_v39  ;;  %v1957_v45 = vmul.f32 %v1836_v15, %v517_v19 }
 0x2ba   :  { %v1961_v47 = vmul.f32 %v512_v13, %v186_v57  ;;  %v524_v48 = vmul.f32 %v1946_v41, %v1946_v41  ;;  %v1965_v49 = vmul.f32 0.0, %v513_v42  ;;  %v520_v0 = vsub.f32 %v1923_v16, %v1950_v43 }
 0x2bb   :  { %v521_v50 = vsub.f32 %v1928_v46, %v1950_v43  ;;  %v525_v51 = vmul.f32 %v1954_v44, %v1954_v44  ;;  %v548_v52 = vmul.f32 %v1952_v28, %v1952_v28  ;;  %v549_v10 = vmul.f32 %v1957_v45, %v1957_v45 }
 0x2bc   :  { %v536_v57 = vmul.f32 %v1961_v47, %v1961_v47  ;;  %v1979_v53 = vmul.f32 0.0, %v520_v0  ;;  %v526_v54 = vsel %vm458_vm5, %v524_v48, 0.0  ;;  %v537_v16 = vmul.f32 %v1965_v49, %v1965_v49 }
 0x2bd   :  { %v523_v46 = vmul.f32 %v521_v50, %v191_v63  ;;  %v527_v55 = vsel %vm458_vm5, %v525_v51, 0.0  ;;  %v550_v56 = vsel %vm458_vm5, %v548_v52, 0.0  ;;  %v551_v58 = vsel %vm458_vm5, %v549_v10, 0.0 }
 0x2be   :  { %v528_v59 = vadd.f32 %v527_v55, %v526_v54  ;;  %v538_v60 = vsel %vm458_vm5, %v536_v57, 0.0  ;;  %v539_v61 = vsel %vm458_vm5, %v537_v16, 0.0  ;;  %v552_v62 = vadd.f32 %v551_v58, %v550_v56 }
 0x2bf   :  { %v540_v1 = vadd.f32 %v539_v61, %v538_v60  ;;  %v560_v2 = vmul.f32 %v1979_v53, %v1979_v53  ;;  %v561_v6 = vmul.f32 %v523_v46, %v523_v46 }
 0x2c0   :  { %v529_v7 = vrot.slane %v528_v59, 4  ;;  %v553_v15 = vrot.slane %v552_v62, 4 }
 0x2c1   :  { %v541_v63 = vrot.slane %v540_v1, 4  ;;  %v562_v14 = vsel %vm458_vm5, %v560_v2, 0.0  ;;  %v563_v17 = vsel %vm458_vm5, %v561_v6, 0.0 }
 0x2c2   :  { %v530_v18 = vadd.f32 %v529_v7, %v528_v59  ;;  %v554_v21 = vadd.f32 %v553_v15, %v552_v62  ;;  %v564_v22 = vadd.f32 %v563_v17, %v562_v14  ;;  %v594_v7 = vld [vmem:[#allocation14] sm:$0xff] }
 0x2c3   :  { %v542_v23 = vadd.f32 %v541_v63, %v540_v1  ;;  %v1135_v63 = vld [vmem:[#allocation8] ss:$0 sm:$0xff] }
 0x2c4   :  { %v531_v24 = vrot.slane %v530_v18, 2  ;;  %v555_v25 = vrot.slane %v554_v21, 2  ;;  %v565_v26 = vrot.slane %v564_v22, 4 }
 0x2c5   :  { %v543_v27 = vrot.slane %v542_v23, 2 }
 0x2c6   :  { %v532_v11 = vadd.f32 %v531_v24, %v530_v18  ;;  %v556_v29 = vadd.f32 %v555_v25, %v554_v21  ;;  %v566_v30 = vadd.f32 %v565_v26, %v564_v22 }
 0x2c7   :  { %v544_v31 = vadd.f32 %v543_v27, %v542_v23 }
 0x2c8   :  { %v533_v32 = vrot.slane %v532_v11, 1  ;;  %v557_v33 = vrot.slane %v556_v29, 1  ;;  %v567_v34 = vrot.slane %v566_v30, 2 }
 0x2c9   :  { %v545_v35 = vrot.slane %v544_v31, 1 }
 0x2ca   :  { %v534_v36 = vadd.f32 %v533_v32, %v532_v11  ;;  %v558_v5 = vadd.f32 %v557_v33, %v556_v29  ;;  %v568_v37 = vadd.f32 %v567_v34, %v566_v30 }
 0x2cb   :  { %v546_v4 = vadd.f32 %v545_v35, %v544_v31  ;;  %v1204_v31 = vld [vmem:[#allocation11] sm:$0x1f]  }
 0x2cc   :  { %v535_v38 = vmul.f32 0.33333334, %v534_v36  ;;  %v559_v39 = vmul.f32 0.25, %v558_v5  ;;  %v569_v40 = vrot.slane %v568_v37, 1  ;;  %v757_v32 = vsel %vm755_vm6, %v1204_v31, 0 }
 0x2cd   :  { %v547_v9 = vmul.f32 0.33333334, %v546_v4  ;;  %1171 = vmatpush3.bf16.msra.mxu1 %v757_v32 }
 0x2ce   :  { %v570_v19 = vadd.f32 %v569_v40, %v568_v37  ;;  %v572_v13 = vadd.f32 1e-10, %v535_v38  ;;  %v582_v42 = vadd.f32 1e-10, %v559_v39 }
 0x2cf   :  { %v576_v48 = vadd.f32 1e-10, %v547_v9 }
 0x2d0   :  { %v1995_v0 = vmul.f32 0.33333334, %v570_v19  ;;  %1214 = vrsqrt.f32 %v572_v13 }
 0x2d1   :  { %1216 = vrsqrt.f32 %v576_v48 }
 0x2d2   :  { %1218 = vrsqrt.f32 %v582_v42  ;;  %v588_v50 = vadd.f32 1e-10, %v1995_v0 }
 0x2d4   :  { %1220 = vrsqrt.f32 %v588_v50 }
 0x2da   :  { %v1215_v51 = vpop.eup %1214 }
 0x2db   :  { %v1217_v52 = vpop.eup %1216  ;;  %v575_v10 = vmul.f32 %v1215_v51, %v1954_v44  ;;  %v574_v57 = vmul.f32 %v1215_v51, %v1946_v41  ;;  %v595_v44 = vld [vmem:[#allocation14 + $0x8] sm:$0xff] }
 0x2dc   :  { %v1219_v54 = vpop.eup %1218  ;;  %v579_v16 = vmul.f32 %v1217_v52, %v1965_v49  ;;  %v578_v55 = vmul.f32 %v1217_v52, %v1961_v47  ;;  %v1136_v47 = vld [vmem:[#allocation5] ss:$0 sm:$0xff] }
 0x2dd   :  { %v585_v56 = vmul.f32 %v1219_v54, %v1957_v45  ;;  %v584_v58 = vmul.f32 %v1219_v54, %v1952_v28 }
 0x2de   :  { %v1221_v59 = vpop.eup %1220  ;;  %v581_v60 = vadd.f32 %v579_v16, %v575_v10  ;;  %v580_v61 = vadd.f32 %v578_v55, %v574_v57 }
 0x2df   :  { %v591_v62 = vmul.f32 %v1221_v59, %v523_v46  ;;  %v590_v1 = vmul.f32 %v1221_v59, %v1979_v53 }
 0x2e0   :  { %v587_v2 = vadd.f32 %v585_v56, %v581_v60  ;;  %v586_v6 = vadd.f32 %v584_v58, %v580_v61  ;;  %v2015_v61 = vsub.s32 1, %v1823_v8 }
 0x2e2   :  { %v593_v41 = vadd.f32 %v591_v62, %v587_v2  ;;  %v592_v15 = vadd.f32 %v590_v1, %v586_v6  ;;  %v2018_v62 = vsub.s32 6, %v1823_v8  ;;  %v668_v1 = vld [vmem:[%s2168_s11] sm:$0xff]  ;;  %v2024_v2 = vsub.s32 2, %v1823_v8 }
 0x2e3   :  { %v2027_v6 = vsub.s32 7, %v1823_v8 }
 0x2e4   :  { %v597_v49 = vadd.f32 %v595_v44, %v593_v41  ;;  %v2005_v14 = vadd.f32 %v594_v7, %v592_v15  ;;  %v673_v44 = vrot.slane %v668_v1, %v2015_v61  ;;  %v705_v7 = vrot.slane %v668_v1, %v2018_v62 }
 0x2e5   :  { %v678_v15 = vrot.slane %v668_v1, %v2024_v2 }
 0x2e6   :  { %v607_v45 = vadd.f32 %v1135_v63, %v597_v49  ;;  %v606_v28 = vadd.f32 %v1135_v63, %v2005_v14  ;;  %v710_v63 = vrot.slane %v668_v1, %v2027_v6 }
 0x2e8   :  { %v615_v17 = vmul.f32 %v1136_v47, %v607_v45  ;;  %v614_v18 = vmul.f32 %v1136_v47, %v606_v28 }
 0x2ea   :  { %v619_v46 = vsel %vm458_vm5, %v615_v17, -inf  ;;  %v616_v53 = vsel %vm458_vm5, %v614_v18, -inf }
 0x2eb   :  { %620 = vmax.xlane.f32.xlu1 %v619_v46  ;;  %617 = vmax.xlane.f32.xlu0 %v616_v53 }
 0x378   :  { %v621_v21 = vpop.xlane.xlu1 %620  ;;  %v618_v22 = vpop.xlane.xlu0 %617 }
 0x379   :  { %v623_v23 = vsub.f32 %v615_v17, %v621_v21  ;;  %v622_v24 = vsub.f32 %v614_v18, %v618_v22 }
 0x37b   :  { %v626_v25 = vmul.f32 1.442695, %v623_v23  ;;  %v624_v26 = vmul.f32 1.442695, %v622_v24  ;;  %v2034_v24 = vsub.s32 3, %v1823_v8 }
 0x37d   :  { %1222 = vpow2.f32 %v626_v25  ;;  %v2037_v25 = vsub.s32 0, %v1823_v8 }
 0x37e   :  { %1224 = vpow2.f32 %v624_v26  ;;  %v2040_v26 = vsub.s32 5, %v1823_v8 }
 0x380   :  { %v721_v31 = vrot.slane %v668_v1, %v2040_v26 }
 0x387   :  { %v1223_v27 = vpop.eup %1222 }
 0x388   :  { %v1225_v11 = vpop.eup %1224  ;;  %v631_v29 = vsel %vm458_vm5, %v1223_v27, 0.0 }
 0x389   :  { %632 = vadd.xlane.f32.xlu1 %v631_v29  ;;  %v628_v30 = vsel %vm458_vm5, %v1225_v11, 0.0  ;;  %v694_v29 = vrot.slane %v668_v1, %v2034_v24 }
 0x38a   :  { %629 = vadd.xlane.f32.xlu0 %v628_v30  ;;  %v2048_v30 = vsub.s32 4, %v1823_v8 }
 0x416   :  { %v633_v33 = vpop.xlane.xlu1 %632 }
 0x417   :  { %1226 = vrcp.f32 %v633_v33  ;;  %v630_v34 = vpop.xlane.xlu0 %629 }
 0x418   :  { %1228 = vrcp.f32 %v630_v34 }
 0x421   :  { %v1227_v35 = vpop.eup %1226 }
 0x422   :  { %v1229_v36 = vpop.eup %1228  ;;  %v637_v5 = vmul.f32 %v1227_v35, %v1223_v27  ;;  %v669_v27 = vld [vmem:[%s2168_s11 + $0x8] sm:$0xff] }
 0x423   :  { %v635_v37 = vmul.f32 %v1229_v36, %v1225_v11  ;;  %v689_v11 = vrot.slane %v668_v1, %v2037_v25  ;;  %v726_v32 = vrot.slane %v669_v27, %v2037_v25 }
 0x424   :  { %638 = vst.msk [vmem:[#allocation16] sm:$0xff] %vm458_vm5, %v637_v5  ;;  %v700_v5 = vrot.slane %v668_v1, %v2048_v30 }
 0x425   :  { %v641_v4 = vrot.slane %v635_v37, 4  ;;  %639 = vst.msk [vmem:[#allocation17] sm:$0xff] %vm458_vm5, %v635_v37 }
 0x427   :  { %v644_v38 = vsel %vm643_vm7, %v641_v4, 0.0 }
 0x428   :  { %v645_v39 = vrot.slane %v644_v38, 4 }
 0x42a   :  { %v646_v40 = vadd.f32 %v645_v39, %v644_v38  ;;  %v732_v39 = vrot.slane %v669_v27, %v2015_v61 }
 0x42c   :  { %v647_v9 = vrot.slane %v646_v40, 2 }
 0x42e   :  { %v648_v19 = vadd.f32 %v647_v9, %v646_v40 }
 0x430   :  { %v649_v13 = vrot.slane %v648_v19, 1 }
 0x432   :  { %v650_v42 = vadd.f32 %v649_v13, %v648_v19 }
 0x434   :  { %v651_v48 = vmul.f32 0.25, %v650_v42 }
 0x436   :  { %v652_v50 = vsub.f32 %v635_v37, %v651_v48 }
 0x438   :  { %v653_v51 = vmul.f32 %v652_v50, %v652_v50 }
 0x43a   :  { %v655_v52 = vrot.slane %v653_v51, 4 }
 0x43c   :  { %v657_v10 = vsel %vm643_vm7, %v655_v52, 0.0 }
 0x43d   :  { %v658_v57 = vrot.slane %v657_v10, 4 }
 0x43f   :  { %v659_v54 = vadd.f32 %v658_v57, %v657_v10  ;;  %v1205_v57 = vld [vmem:[#allocation10] sm:$0xff]  }
 0x440   :  { %1177 = vmatpush3.bf16.msra.mxu0 %v1205_v57 }
 0x441   :  { %v660_v16 = vrot.slane %v659_v54, 2 }
 0x443   :  { %v661_v55 = vadd.f32 %v660_v16, %v659_v54 }
 0x445   :  { %v662_v56 = vrot.slane %v661_v55, 1 }
 0x447   :  { %v663_v58 = vadd.f32 %v662_v56, %v661_v55 }
 0x449   :  { %v664_v59 = vmul.f32 0.33333334, %v663_v58 }
 0x44b   :  { %v665_v60 = vadd.f32 1e-10, %v664_v59 }
 0x44d   :  { %1230 = vrsqrt.f32 %v665_v60 }
 0x457   :  { %v1231_v41 = vpop.eup %1230 }
 0x458   :  { %v667_v49 = vmul.f32 %v1231_v41, %v652_v50 }
 0x45a   :  { %v674_v47 = vmul.f32 %v673_v44, %v667_v49  ;;  %v706_v45 = vmul.f32 %v705_v7, %v667_v49  ;;  %v695_v36 = vmul.f32 %v694_v29, %v667_v49  ;;  %v727_v4 = vmul.f32 %v726_v32, %v667_v49 }
 0x45c   :  { %v679_v28 = vadd.f32 %v678_v15, %v674_v47  ;;  %v711_v17 = vadd.f32 %v710_v63, %v706_v45 }
 0x45e   :  { %v1137_v18 = vmul.f32 -1.442695, %v679_v28  ;;  %v1138_v46 = vmul.f32 -1.442695, %v711_v17 }
 0x460   :  { %1232 = vpow2.f32 %v1137_v18 }
 0x461   :  { %1234 = vpow2.f32 %v1138_v46 }
 0x46a   :  { %v1233_v53 = vpop.eup %1232 }
 0x46b   :  { %v1235_v21 = vpop.eup %1234  ;;  %v683_v22 = vadd.f32 1.0, %v1233_v53  ;;  %v821_v53 = vld [vmem:[%s2167_s10] sm:$0xff] }
 0x46c   :  { %v715_v23 = vadd.f32 1.0, %v1235_v21  ;;  %v826_v21 = vrot.slane %v821_v53, %v2015_v61  ;;  %v863_v29 = vrot.slane %v821_v53, %v2027_v6 }
 0x46d   :  { %1236 = vrcp.f32 %v683_v22  ;;  %v858_v22 = vrot.slane %v821_v53, %v2018_v62 }
 0x46e   :  { %1238 = vrcp.f32 %v715_v23 }
 0x46f   :  { %1240 = vrcp.f32 %v1995_v0 }
 0x477   :  { %v1237_v33 = vpop.eup %1236 }
 0x478   :  { %v1239_v34 = vpop.eup %1238  ;;  %v690_v35 = vmul.f32 %v1237_v33, %v689_v11  ;;  %v831_v11 = vrot.slane %v821_v53, %v2024_v2 }
 0x479   :  { %v722_v37 = vmul.f32 %v1239_v34, %v721_v31  ;;  %v1241_v51 = vpop.eup %1240 }
 0x47a   :  { %v696_v38 = vadd.f32 %v695_v36, %v690_v35 }
 0x47b   :  { %v728_v40 = vadd.f32 %v727_v4, %v722_v37 }
 0x47c   :  { %v701_v8 = vadd.f32 %v700_v5, %v696_v38 }
 0x47d   :  { %v733_v9 = vadd.f32 %v732_v39, %v728_v40  ;;  %v822_v39 = vld [vmem:[%s2167_s10 + $0x8] sm:$0xff]  ;;  %v842_v40 = vrot.slane %v821_v53, %v2037_v25  ;;  %s1581_s10 = smov [#allocation17]  }
 0x47e   :  { %v734_v19 = vsub.f32 %v2005_v14, %v701_v8  ;;  %v885_v57 = vrot.slane %v822_v39, %v2015_v61  ;;  %s1070_s30 = sshll.u32 %s1581_s10, 4  ;;  %s1071_s30 = int_to_ptr.vmem [resolvable:$true] %s1070_s30 }
 0x47f   :  { %s1441_s23 = scalar_lea.vmem %s1071_s30, 128  ;;  %p1446_p9 = scmp.lt.s32.totalorder %s1071_s30, %s1071_s30 }
 0x480   :  { %v735_v13 = vmul.f32 %v734_v19, %v733_v9  ;;  %v874_v9 = vrot.slane %v821_v53, %v2040_v26  ;;  %v879_v19 = vrot.slane %v822_v39, %v2037_v25  ;;  %p1442_p8 = scmp.ne.s32.totalorder %s1071_s30, %s1441_s23  ;;  %p1447_p10 = scmp.lt.s32.totalorder %s1441_s23, %s1441_s23 }
 0x482   :  { %v736_v42 = vadd.f32 %v735_v13, %v701_v8  ;;  %v847_v8 = vrot.slane %v821_v53, %v2034_v24  ;;  %p1448_p11 = por %p1447_p10, %p1446_p9 }
 0x484   :  { %v742_v48 = vpack.c.bf16 %v736_v42, %v736_v42  ;;  %v737_v50 = vsub.f32 %v736_v42, %v1950_v43  ;;  %p1449_p12 = pnand %p1448_p11, %p1442_p8 }
 0x486   :  { %v746_v52 = vrot.slane %v742_v48, 2  ;;  %v739_v10 = vmul.f32 %v1241_v51, %v737_v50  ;;  %v853_v51 = vrot.slane %v821_v53, %v2048_v30 }
 0x488   :  { %1173 = vmatmul.mubr.msk.bf16.vlgmr.msra.gmra.mrb[4].mxu1 %vm458_vm5, %v746_v52  ;;  %741 = vst.msk [vmem:[#allocation22 - $0x4] sm:$0xf0] %vm740_vm8, %v739_v10 }
 0x55b   :  { %v793_v0 = vpop.f32.mrb[4].mxu1 }
 0x55c   :  { %v800_v54 = vsel %vm799_vm9, %v793_v0, 0.0  ;;  %v1174_v16 = vpop.f32.mrb[5].mxu1 }
 0x55d   :  { %v801_v55 = vrot.slane %v800_v54, 4  ;;  %v796_v14 = vpop.f32.mrb[6].mxu1 }
 0x55e   :  { %v1175_v56 = vpop.f32.mrb[7].mxu1 }
 0x55f   :  { %v802_v58 = vadd.f32 %v801_v55, %v800_v54 }
 0x561   :  { %v803_v59 = vrot.slane %v802_v58, 2 }
 0x563   :  { %v804_v60 = vadd.f32 %v803_v59, %v802_v58 }
 0x565   :  { %v805_v43 = vrot.slane %v804_v60, 1 }
 0x567   :  { %v806_v1 = vadd.f32 %v805_v43, %v804_v60 }
 0x569   :  { %v807_v44 = vmul.f32 0.25, %v806_v1 }
 0x56b   :  { %v808_v7 = vsub.f32 %v793_v0, %v807_v44 }
 0x56d   :  { %v809_v41 = vmul.f32 %v808_v7, %v808_v7 }
 0x56f   :  { %v810_v15 = vsel %vm799_vm9, %v809_v41, 0.0 }
 0x570   :  { %v811_v63 = vrot.slane %v810_v15, 4 }
 0x572   :  { %v812_v49 = vadd.f32 %v811_v63, %v810_v15 }
 0x574   :  { %v813_v47 = vrot.slane %v812_v49, 2 }
 0x576   :  { %v814_v45 = vadd.f32 %v813_v47, %v812_v49 }
 0x578   :  { %v815_v28 = vrot.slane %v814_v45, 1 }
 0x57a   :  { %v816_v17 = vadd.f32 %v815_v28, %v814_v45 }
 0x57c   :  { %v817_v18 = vmul.f32 0.33333334, %v816_v17 }
 0x57e   :  { %v818_v46 = vadd.f32 1e-10, %v817_v18 }
 0x580   :  { %1242 = vrsqrt.f32 %v818_v46 }
 0x58a   :  { %v1243_v23 = vpop.eup %1242 }
 0x58b   :  { %v820_v27 = vmul.f32 %v1243_v23, %v808_v7 }
 0x58d   :  { %v827_v31 = vmul.f32 %v826_v21, %v820_v27  ;;  %v859_v32 = vmul.f32 %v858_v22, %v820_v27  ;;  %v848_v50 = vmul.f32 %v847_v8, %v820_v27  ;;  %v880_v10 = vmul.f32 %v879_v19, %v820_v27 }
 0x58f   :  { %v832_v33 = vadd.f32 %v831_v11, %v827_v31  ;;  %v864_v34 = vadd.f32 %v863_v29, %v859_v32 }
 0x591   :  { %v1141_v35 = vmul.f32 -1.442695, %v832_v33  ;;  %v1142_v36 = vmul.f32 -1.442695, %v864_v34 }
 0x593   :  { %1244 = vpow2.f32 %v1141_v35 }
 0x594   :  { %1246 = vpow2.f32 %v1142_v36 }
 0x59d   :  { %v1245_v5 = vpop.eup %1244 }
 0x59e   :  { %v1247_v37 = vpop.eup %1246  ;;  %v836_v4 = vadd.f32 1.0, %v1245_v5 }
 0x59f   :  { %v868_v38 = vadd.f32 1.0, %v1247_v37 }
 0x5a0   :  { %1248 = vrcp.f32 %v836_v4 }
 0x5a1   :  { %1250 = vrcp.f32 %v868_v38 }
 0x5a2   :  { %1252 = vrcp.f32 %v1907_v20 }
 0x5aa   :  { %v1249_v13 = vpop.eup %1248 }
 0x5ab   :  { %v1251_v42 = vpop.eup %1250  ;;  %v843_v48 = vmul.f32 %v1249_v13, %v842_v40 }
 0x5ac   :  { %v875_v52 = vmul.f32 %v1251_v42, %v874_v9  ;;  %v1253_v44 = vpop.eup %1252 }
 0x5ad   :  { %v849_v0 = vadd.f32 %v848_v50, %v843_v48 }
 0x5ae   :  { %v881_v54 = vadd.f32 %v880_v10, %v875_v52 }
 0x5af   :  { %v854_v16 = vadd.f32 %v853_v51, %v849_v0 }
 0x5b0   :  { %v886_v55 = vadd.f32 %v885_v57, %v881_v54 }
 0x5b1   :  { %v888_v14 = vrot.slane %v854_v16, 4 }
 0x5b2   :  { %v892_v58 = vrot.slane %v886_v55, 4 }
 0x5b3   :  { %v890_v56 = vsub.f32 %v1917_v12, %v888_v14 }
 0x5b5   :  { %v894_v59 = vmul.f32 %v892_v58, %v890_v56 }
 0x5b7   :  { %v895_v60 = vadd.f32 %v894_v59, %v888_v14 }
 0x5b9   :  { %v901_v43 = vpack.c.bf16 %v895_v60, %v895_v60  ;;  %v896_v1 = vsub.f32 %v895_v60, %v1857_v3 }
 0x5bb   :  { %v905_v7 = vrot.slane %v901_v43, 2  ;;  %v898_v41 = vmul.f32 %v1253_v44, %v896_v1 }
 0x5bd   :  { %1179 = vmatmul.mubr.msk.bf16.vlgmr.msra.gmra.mrb[4].mxu0 %vm254_vm4, %v905_v7  ;;  %900 = vst.msk [vmem:[#allocation20 - $0x4] sm:$0xf0] %vm899_vm10, %v898_v41 }
 0x5be   :  { %1452 = shalt.err (!%p1449_p12)
}
 0x5bf   :  { %s1453_s13 = scalar_lea.hbm %s2172_s15, 128 }
 0x5c0   :  { %p1454_p13 = scmp.ne.s32.totalorder %s2172_s15, %s1453_s13  ;;  %p1457_p0 = scmp.lt.u32.totalorder %s1453_s13, %s2172_s15 }
 0x5c2   :  { %p1459_p1 = pnand %p1457_p0, %p1454_p13 }
 0x5c4   :  { %1462 = shalt.err (!%p1459_p1)
}
 0x5c5   :  { %1073 = dma.vmem_to_hbm [thread:$0]  %s1071_s30, 128, %s2172_s15, [#allocation18]  }
 0x5c6   :  { %s1463_s28 = scalar_lea.vmem %s1091_s25, 64  ;;  %p1468_p3 = scmp.lt.s32.totalorder %s1091_s25, %s1091_s25 }
 0x5c7   :  { %p1464_p2 = scmp.ne.s32.totalorder %s1091_s25, %s1463_s28  ;;  %p1469_p4 = scmp.lt.s32.totalorder %s1463_s28, %s1463_s28 }
 0x5c9   :  { %p1470_p5 = por %p1469_p4, %p1468_p3 }
 0x5cb   :  { %p1471_p6 = pnand %p1470_p5, %p1464_p2 }
 0x5cd   :  { %1474 = shalt.err (!%p1471_p6)
}
 0x5ce   :  { %s1475_s6 = scalar_lea.hbm %s2174_s17, 64 }
 0x5cf   :  { %p1476_p7 = scmp.ne.s32.totalorder %s2174_s17, %s1475_s6  ;;  %p1479_p8 = scmp.lt.u32.totalorder %s1475_s6, %s2174_s17 }
 0x5d1   :  { %p1481_p9 = pnand %p1479_p8, %p1476_p7 }
 0x5d3   :  { %1484 = shalt.err (!%p1481_p9)
}
 0x5d4   :  { %1093 = dma.vmem_to_hbm [thread:$0]  %s1091_s25, 64, %s2174_s17, [#allocation21]  }
 0x5d5   :  { %s1583_s5 = smov [#allocation16]  }
 0x5d6   :  { %s1060_s10 = sshll.u32 %s1583_s5, 4  ;;  %s1061_s10 = int_to_ptr.vmem [resolvable:$true] %s1060_s10 }
 0x5d7   :  { %s1485_s30 = scalar_lea.vmem %s1061_s10, 128  ;;  %p1490_p11 = scmp.lt.s32.totalorder %s1061_s10, %s1061_s10 }
 0x5d8   :  { %p1486_p10 = scmp.ne.s32.totalorder %s1061_s10, %s1485_s30  ;;  %p1491_p12 = scmp.lt.s32.totalorder %s1485_s30, %s1485_s30 }
 0x5da   :  { %p1492_p13 = por %p1491_p12, %p1490_p11 }
 0x5dc   :  { %p1493_p0 = pnand %p1492_p13, %p1486_p10 }
 0x5de   :  { %1496 = shalt.err (!%p1493_p0)
}
 0x5df   :  { %s1497_s12 = scalar_lea.hbm %s2171_s14, 128 }
 0x5e0   :  { %p1498_p1 = scmp.ne.s32.totalorder %s2171_s14, %s1497_s12  ;;  %p1501_p2 = scmp.lt.u32.totalorder %s1497_s12, %s2171_s14 }
 0x5e2   :  { %p1503_p3 = pnand %p1501_p2, %p1498_p1 }
 0x5e4   :  { %1506 = shalt.err (!%p1503_p3)
}
 0x5e5   :  { %1063 = dma.vmem_to_hbm [thread:$0]  %s1061_s10, 128, %s2171_s14, [#allocation4]  }
 0x5e6   :  { %s1584_s29 = smov [#allocation22]  }
 0x5e7   :  { %s1100_s8 = sshll.u32 %s1584_s29, 4  ;;  %s1101_s8 = int_to_ptr.vmem [resolvable:$true] %s1100_s8 }
 0x5e8   :  { %s1507_s2 = scalar_lea.vmem %s1101_s8, 64  ;;  %p1512_p5 = scmp.lt.s32.totalorder %s1101_s8, %s1101_s8 }
 0x5e9   :  { %p1508_p4 = scmp.ne.s32.totalorder %s1101_s8, %s1507_s2  ;;  %p1513_p6 = scmp.lt.s32.totalorder %s1507_s2, %s1507_s2 }
 0x5eb   :  { %p1514_p7 = por %p1513_p6, %p1512_p5 }
 0x5ed   :  { %p1515_p8 = pnand %p1514_p7, %p1508_p4 }
 0x5ef   :  { %1518 = shalt.err (!%p1515_p8)
}
 0x5f0   :  { %s1519_s1 = scalar_lea.hbm %s2175_s18, 64 }
 0x5f1   :  { %p1520_p9 = scmp.ne.s32.totalorder %s2175_s18, %s1519_s1  ;;  %p1523_p10 = scmp.lt.u32.totalorder %s1519_s1, %s2175_s18 }
 0x5f3   :  { %p1525_p11 = pnand %p1523_p10, %p1520_p9 }
 0x5f5   :  { %1528 = shalt.err (!%p1525_p11)
}
 0x5f6   :  { %1103 = dma.vmem_to_hbm [thread:$0]  %s1101_s8, 64, %s2175_s18, [#allocation21]   ;;  %vm955_vm11 = vcmask 257024   ;;  %v977_v35 = vld [vmem:[%s2166_s9] sm:$0xff]  ;;  %vm1052_vm12 = vcmask 261124  }
 0x5f7   :  { %v982_v36 = vrot.slane %v977_v35, %v2015_v61  ;;  %v1014_v5 = vrot.slane %v977_v35, %v2018_v62  ;;  %v987_v38 = vrot.slane %v977_v35, %v2024_v2  ;;  %v1019_v39 = vrot.slane %v977_v35, %v2027_v6  ;;  %v978_v62 = vld [vmem:[%s2166_s9 + $0x8] sm:$0xff]  ;;  %s1585_s10 = smov [#allocation19]  }
 0x5f8   :  { %v1003_v2 = vrot.slane %v977_v35, %v2034_v24  ;;  %v998_v6 = vrot.slane %v977_v35, %v2037_v25  ;;  %v1030_v10 = vrot.slane %v977_v35, %v2040_v26  ;;  %v1035_v57 = vrot.slane %v978_v62, %v2037_v25  ;;  %v1264_v26 = vld [vmem:[%s2184_s7] sm:$0xff]  ;;  %s1080_s30 = sshll.u32 %s1585_s10, 4  ;;  %s1081_s30 = int_to_ptr.vmem [resolvable:$true] %s1080_s30 }
 0x5f9   :  { %v1009_v14 = vrot.slane %v977_v35, %v2048_v30  ;;  %v1041_v59 = vrot.slane %v978_v62, %v2015_v61  ;;  %s1529_s24 = scalar_lea.vmem %s1081_s30, 64  ;;  %p1534_p13 = scmp.lt.s32.totalorder %s1081_s30, %s1081_s30 }
 0x5fa   :  { %p1530_p12 = scmp.ne.s32.totalorder %s1081_s30, %s1529_s24  ;;  %p1535_p0 = scmp.lt.s32.totalorder %s1529_s24, %s1529_s24 }
 0x5fc   :  { %p1536_p1 = por %p1535_p0, %p1534_p13 }
 0x5fe   :  { %p1537_p2 = pnand %p1536_p1, %p1530_p12 }
 0x690   :  { %v949_v3 = vpop.f32.mrb[4].mxu0 }
 0x691   :  { %v956_v20 = vsel %vm955_vm11, %v949_v3, 0.0  ;;  %v1180_v12 = vpop.f32.mrb[5].mxu0 }
 0x692   :  { %v957_v15 = vrot.slane %v956_v20, 4  ;;  %v952_v63 = vpop.f32.mrb[6].mxu0 }
 0x693   :  { %v1181_v49 = vpop.f32.mrb[7].mxu0 }
 0x694   :  { %v958_v47 = vadd.f32 %v957_v15, %v956_v20 }
 0x696   :  { %v959_v45 = vrot.slane %v958_v47, 2 }
 0x698   :  { %v960_v28 = vadd.f32 %v959_v45, %v958_v47 }
 0x69a   :  { %v961_v17 = vrot.slane %v960_v28, 1 }
 0x69c   :  { %v962_v18 = vadd.f32 %v961_v17, %v960_v28 }
 0x69e   :  { %v963_v46 = vmul.f32 0.25, %v962_v18 }
 0x6a0   :  { %v964_v53 = vsub.f32 %v949_v3, %v963_v46 }
 0x6a2   :  { %v965_v21 = vmul.f32 %v964_v53, %v964_v53 }
 0x6a4   :  { %v966_v22 = vsel %vm955_vm11, %v965_v21, 0.0 }
 0x6a5   :  { %v967_v23 = vrot.slane %v966_v22, 4 }
 0x6a7   :  { %v968_v27 = vadd.f32 %v967_v23, %v966_v22 }
 0x6a9   :  { %v969_v11 = vrot.slane %v968_v27, 2 }
 0x6ab   :  { %v970_v29 = vadd.f32 %v969_v11, %v968_v27 }
 0x6ad   :  { %v971_v31 = vrot.slane %v970_v29, 1 }
 0x6af   :  { %v972_v32 = vadd.f32 %v971_v31, %v970_v29 }
 0x6b1   :  { %v973_v33 = vmul.f32 0.33333334, %v972_v32 }
 0x6b3   :  { %v974_v34 = vadd.f32 1e-10, %v973_v33 }
 0x6b5   :  { %1254 = vrsqrt.f32 %v974_v34 }
 0x6bf   :  { %v1255_v37 = vpop.eup %1254 }
 0x6c0   :  { %v976_v4 = vmul.f32 %v1255_v37, %v964_v53 }
 0x6c2   :  { %v983_v40 = vmul.f32 %v982_v36, %v976_v4  ;;  %v1015_v8 = vmul.f32 %v1014_v5, %v976_v4  ;;  %v1004_v16 = vmul.f32 %v1003_v2, %v976_v4  ;;  %v1036_v58 = vmul.f32 %v1035_v57, %v976_v4 }
 0x6c4   :  { %v988_v9 = vadd.f32 %v987_v38, %v983_v40  ;;  %v1020_v19 = vadd.f32 %v1019_v39, %v1015_v8 }
 0x6c6   :  { %v1145_v13 = vmul.f32 -1.442695, %v988_v9  ;;  %v1146_v42 = vmul.f32 -1.442695, %v1020_v19 }
 0x6c8   :  { %1256 = vpow2.f32 %v1145_v13 }
 0x6c9   :  { %1258 = vpow2.f32 %v1146_v42 }
 0x6d2   :  { %v1257_v48 = vpop.eup %1256 }
 0x6d3   :  { %v1259_v50 = vpop.eup %1258  ;;  %v992_v51 = vadd.f32 1.0, %v1257_v48 }
 0x6d4   :  { %v1024_v52 = vadd.f32 1.0, %v1259_v50 }
 0x6d5   :  { %1260 = vrcp.f32 %v992_v51 }
 0x6d6   :  { %1262 = vrcp.f32 %v1024_v52 }
 0x6df   :  { %v1261_v0 = vpop.eup %1260 }
 0x6e0   :  { %v1263_v54 = vpop.eup %1262  ;;  %v999_v55 = vmul.f32 %v1261_v0, %v998_v6 }
 0x6e1   :  { %v1031_v56 = vmul.f32 %v1263_v54, %v1030_v10 }
 0x6e2   :  { %v1005_v60 = vadd.f32 %v1004_v16, %v999_v55 }
 0x6e3   :  { %v1037_v43 = vadd.f32 %v1036_v58, %v1031_v56 }
 0x6e4   :  { %v1010_v1 = vadd.f32 %v1009_v14, %v1005_v60 }
 0x6e5   :  { %v1042_v24 = vadd.f32 %v1041_v59, %v1037_v43 }
 0x6e6   :  { %v1044_v44 = vrot.slane %v1010_v1, 4 }
 0x6e7   :  { %v1048_v7 = vrot.slane %v1042_v24, 4 }
 0x6e8   :  { %v1046_v25 = vsub.f32 %v1264_v26, %v1044_v44 }
 0x6ea   :  { %v1050_v41 = vmul.f32 %v1048_v7, %v1046_v25 }
 0x6ec   :  { %v1051_v30 = vadd.f32 %v1050_v41, %v1044_v44 }
 0x6ee   :  { %1053 = vst.msk [vmem:[#allocation19 - $0x4] sm:$0xf0] %vm1052_vm12, %v1051_v30 }
 0x6ef   :  { %1540 = shalt.err (!%p1537_p2)
}
 0x6f0   :  { %s1541_s7 = scalar_lea.hbm %s2173_s16, 64 }
 0x6f1   :  { %p1542_p3 = scmp.ne.s32.totalorder %s2173_s16, %s1541_s7  ;;  %p1545_p4 = scmp.lt.u32.totalorder %s1541_s7, %s2173_s16 }
 0x6f3   :  { %p1547_p5 = pnand %p1545_p4, %p1542_p3 }
 0x6f5   :  { %1550 = shalt.err (!%p1547_p5)
}
 0x6f6   :  { %1083 = dma.vmem_to_hbm [thread:$0]  %s1081_s30, 64, %s2173_s16, [#allocation18]  }
 0x6f7   :  { %1561 = dma.done.wait [#allocation4], 128  }
 0x6f8   :  { %1562 = vsyncadd [#allocation4], 4294967168 }
 0x6f9   :  { %1563 = dma.done.wait [#allocation18], 192  }
 0x6fa   :  { %1564 = vsyncadd [#allocation18], 4294967104 }
 0x6fb   :  { %1565 = dma.done.wait [#allocation21], 128  }
 0x6fc   :  { %1566 = vsyncadd [#allocation21], 4294967168 }
 0x6fd   :  { %1119 = vsyncpa [#allocation3], 1 }
 0x6fe   :  { %1120 = vsyncpa [#allocation6], 1 }
 0x6ff   :  { %1121 = vsyncpa [#allocation9], 1 }
 0x700   :  { %1122 = vsyncpa [#allocation12], 1 }
 0x701   :  { %1123 = vsyncpa [#allocation15], 1 }
 0x702   :  { %1124 = vsyncpa [#allocation4], 1 }
 0x703   :  { %1125 = vsyncpa [#allocation18], 1 }
 0x704   :  { %1126 = vsyncpa [#allocation21], 1 }

</bundles_post_ra>
